<compile_context>
chip_gen: v5e
topology: v5e:2x2
jax: 0.10.0
libtpu: 0.0.40
codegen_flags: <defaults>
</compile_context>

<pallas_src>
import math

import jax
import jax.numpy as jnp
from jax import lax
from jax.experimental import pallas as pl
from jax.experimental.pallas import tpu as pltpu


def _attention_kernel(q_ref, k_ref, v_ref, o_ref, acc_ref):
    # Grid = (batch, Dv tiles, Lk tiles).  Refs (batch dim squeezed):
    #   q_ref: (Lq, D), k_ref: (tk, D), v_ref: (tk, tdv)
    #   o_ref: (Lq, tdv), acc_ref: (Lq, tdv) f32 scratch, resident across k.
    k_step = pl.program_id(2)

    @pl.when(k_step == 0)
    def _():
        acc_ref[...] = jnp.zeros_like(acc_ref)

    d = q_ref.shape[-1]
    scale = 1.0 / math.sqrt(float(d))

    q = q_ref[...]                               # (Lq, D)   MXU dtype (bf16)
    k = k_ref[...]                               # (tk, D)   MXU dtype
    v = v_ref[...]                               # (tk, tdv) MXU dtype

    # scores = q @ k^T without materializing a transposed copy of k:
    # contract the last dim of both operands, accumulate in f32 on the MXU.
    scores = lax.dot_general(
        q, k,
        dimension_numbers=(((1,), (1,)), ((), ())),
        preferred_element_type=jnp.float32,
    )                                            # (Lq, tk) f32

    # Softmax over the QUERY axis (torch dim=1).  Lq is never tiled, so every
    # key column of this Lk tile sees all queries -> exact per tile, and each
    # tile's contribution to the output is purely additive.
    # 1/sqrt(D) is applied here in f32: exp((s - m) * c) is the standard stable
    # softmax of the scaled scores (m = per-column max, c > 0).
    m = jnp.max(scores, axis=0, keepdims=True)       # (1, tk)
    p = jnp.exp((scores - m) * scale)                # (Lq, tk) f32
    denom = jnp.sum(p, axis=0, keepdims=True)        # (1, tk)
    r = pl.reciprocal(denom, approx=False)           # exact, per key column

    # Normalize + cast in the same pass that produces the bf16 matmul operand;
    # no separate f32 `weights` temporary.
    p_mxu = (p * r).astype(v.dtype)                  # (Lq, tk) bf16

    # Accumulate this Lk tile's contribution: weights_tile @ value_tile.
    acc_ref[...] += jnp.dot(p_mxu, v, preferred_element_type=jnp.float32)

    @pl.when(k_step == pl.num_programs(2) - 1)
    def _():
        o_ref[...] = acc_ref[...].astype(o_ref.dtype)


_LK_TILE_CANDIDATES = (4096, 2048, 1024, 512, 256, 128)


def _vmem_capacity_bytes():
    # Per-TensorCore VMEM: 128 MiB on v5e/v6e, 64 MiB on v7x.
    try:
        return int(pltpu.get_tpu_info().vmem_capacity_bytes)
    except Exception:
        return 64 * 1024 * 1024  # conservative fallback (v7x per-TC)


def _footprint_bytes(lq, d, tdv, tlk, mxu_itemsize, out_itemsize):
    # Estimated VMEM footprint for one grid step (review's budget formula).
    kv = 2 * tlk * (d + tdv) * mxu_itemsize      # double-buffered K / V tiles
    qb = 2 * lq * d * mxu_itemsize               # double-buffered Q tile
    acc = lq * tdv * 4                           # f32 accumulator scratch
    out = 2 * lq * tdv * out_itemsize            # double-buffered output tile
    tmp = 2 * lq * tlk * 4                       # scores / exp f32 temporaries
    return kv + qb + acc + out + tmp


def _pick_lk_tile(lk, lq, d, tdv, mxu_itemsize, out_itemsize, budget):
    # Largest MXU-friendly tile that divides Lk and fits the VMEM budget
    # (prefers >= 256 naturally: candidates are tried large -> small).
    divisors = [c for c in _LK_TILE_CANDIDATES if lk % c == 0]
    for cand in divisors:
        if _footprint_bytes(lq, d, tdv, cand, mxu_itemsize, out_itemsize) <= budget:
            return cand
    if divisors:
        return divisors[-1]
    return lk  # small / irregular Lk: take it whole


def dot_product_attention(query, key, value, *, block_lk=None, block_dv=None,
                          mxu_dtype=jnp.bfloat16):
    """query: (B, Lq, D), key: (B, Lk, D), value: (B, Lk, Dv) -> (B, Lq, Dv)."""
    B, Lq, D = query.shape
    Bk, Lk, Dk = key.shape
    Bv, Lv, Dv = value.shape
    assert (B, D) == (Bk, Dk) and (B, Lk) == (Bv, Lv)

    out_dtype = query.dtype

    # Feed the MXU 16-bit operands; f32 accumulation/softmax stay in-kernel.
    def _maybe_downcast(x):
        if mxu_dtype is None:
            return x
        if jnp.dtype(x.dtype).itemsize > jnp.dtype(mxu_dtype).itemsize:
            return x.astype(mxu_dtype)
        return x

    query, key, value = map(_maybe_downcast, (query, key, value))
    mxu_itemsize = jnp.dtype(query.dtype).itemsize
    out_itemsize = jnp.dtype(out_dtype).itemsize

    capacity = _vmem_capacity_bytes()

    # Dv tiling: degenerate (one tile) unless the batch alone cannot feed both
    # v7x TensorCores; then split the (parallel) output-feature axis.
    if block_dv is None:
        block_dv = Dv
        if B == 1 and Dv % 256 == 0:
            block_dv = Dv // 2
    assert Dv % block_dv == 0
    num_dv = Dv // block_dv

    if block_lk is None:
        budget = (capacity * 2) // 5   # leave headroom for compiler scratch
        block_lk = _pick_lk_tile(Lk, Lq, D, block_dv, mxu_itemsize,
                                 out_itemsize, budget)
    assert Lk % block_lk == 0
    num_k = Lk // block_lk

    footprint = _footprint_bytes(Lq, D, block_dv, block_lk,
                                 mxu_itemsize, out_itemsize)
    vmem_limit = max(32 << 20, 2 * footprint + (8 << 20))
    vmem_limit = max(16 << 20, min(vmem_limit, capacity - (4 << 20)))

    cost = pl.CostEstimate(
        flops=2 * B * Lq * Lk * (D + Dv),
        transcendentals=B * Lq * Lk * num_dv,
        bytes_accessed=(
            query.size * mxu_itemsize
            + key.size * jnp.dtype(key.dtype).itemsize * num_dv
            + value.size * jnp.dtype(value.dtype).itemsize
            + B * Lq * Dv * out_itemsize
        ),
    )

    return pl.pallas_call(
        _attention_kernel,
        out_shape=jax.ShapeDtypeStruct((B, Lq, Dv), out_dtype),
        grid_spec=pltpu.PrefetchScalarGridSpec(
            num_scalar_prefetch=0,
            grid=(B, num_dv, num_k),     # Lk (reduction) axis last
            in_specs=[
                pl.BlockSpec((None, Lq, D), lambda b, dv, k: (b, 0, 0)),
                pl.BlockSpec((None, block_lk, D), lambda b, dv, k: (b, k, 0)),
                pl.BlockSpec((None, block_lk, block_dv),
                             lambda b, dv, k: (b, k, dv)),
            ],
            # Same output block for every k step -> accumulator stays resident.
            out_specs=pl.BlockSpec((None, Lq, block_dv),
                                   lambda b, dv, k: (b, 0, dv)),
            scratch_shapes=[pltpu.VMEM((Lq, block_dv), jnp.float32)],
        ),
        compiler_params=pltpu.CompilerParams(
            dimension_semantics=("parallel", "parallel", "arbitrary"),
            vmem_limit_bytes=int(vmem_limit),
        ),
        cost_estimate=cost,
    )(query, key, value)


def _reference(query, key, value):
    # Pure-JAX reference mirroring the PyTorch module exactly (f32).
    d = key.shape[-1]
    scores = jnp.einsum("bqd,bkd->bqk", query, key) / jnp.sqrt(jnp.float32(d))
    weights = jax.nn.softmax(scores, axis=1)  # softmax over dim=1 (query axis)
    return jnp.einsum("bqk,bkv->bqv", weights, value)


if __name__ == "__main__":
    rng = jax.random.PRNGKey(0)
    kq, kk, kv = jax.random.split(rng, 3)

    # Small but MXU/lane-aligned shapes (lane-dense loads & stores).
    B, Lq, Lk, D, Dv = 2, 128, 512, 128, 128
    query = jax.random.normal(kq, (B, Lq, D), dtype=jnp.float32)
    key = jax.random.normal(kk, (B, Lk, D), dtype=jnp.float32)
    value = jax.random.normal(kv, (B, Lk, Dv), dtype=jnp.float32)

    out = jax.block_until_ready(dot_product_attention(query, key, value))
    ref = _reference(query, key, value)

    assert out.shape == (B, Lq, Dv), out.shape
    err = float(jnp.max(jnp.abs(out - ref)))
    # bf16 MXU operands (f32 accumulation / f32 softmax): bf16-level tolerance.
    assert jnp.allclose(out, ref, atol=3e-2, rtol=3e-2), err

    print("KERNEL_OK")
</pallas_src>

<mosaic_0001>
module attributes {stable_mosaic.version = 11 : i64} {
  func.func @_attention_kernel(%arg0: i32, %arg1: i32, %arg2: i32, %arg3: memref<1x128x128xbf16, #tpu.memory_space<vmem>>, %arg4: memref<1x512x128xbf16, #tpu.memory_space<vmem>>, %arg5: memref<1x512x128xbf16, #tpu.memory_space<vmem>>, %arg6: memref<1x128x128xf32, #tpu.memory_space<vmem>>, %arg7: memref<128x128xf32, #tpu.memory_space<vmem>>) attributes {dimension_semantics = [#tpu.dimension_semantics<parallel>, #tpu.dimension_semantics<parallel>, #tpu.dimension_semantics<arbitrary>], iteration_bounds = array<i64: 2, 1, 1>, scalar_prefetch = 0 : i64, scratch_operands = 1 : i64, tpu.core_type = #tpu.core_type<tc>, window_params = [{transform_indices = @transform_0, window_bounds = array<i64: 1, 128, 128>}, {transform_indices = @transform_1, window_bounds = array<i64: 1, 512, 128>}, {transform_indices = @transform_2, window_bounds = array<i64: 1, 512, 128>}, {transform_indices = @transform_3, window_bounds = array<i64: 1, 128, 128>}]} {
    %c0_i32 = arith.constant 0 : i32
    %0 = arith.cmpi eq, %arg2, %c0_i32 : i32
    %1 = arith.extui %0 : i1 to i32
    %c0_i32_0 = arith.constant 0 : i32
    %2 = arith.cmpi ne, %1, %c0_i32_0 : i32
    scf.if %2 {
      %cst_19 = arith.constant 0.000000e+00 : f32
      %30 = vector.broadcast %cst_19 : f32 to vector<128x128xf32>
      %c0_20 = arith.constant 0 : index
      %c0_21 = arith.constant 0 : index
      %31 = vector.load %arg7[%c0_20, %c0_21] : memref<128x128xf32, #tpu.memory_space<vmem>>, vector<128x128xf32>
      tpu.vector_store %arg7[%c0_20, %c0_21], %30 {strides = array<i32>} : memref<128x128xf32, #tpu.memory_space<vmem>>, vector<128x128xf32>,
    } else {
    }
    %c0 = arith.constant 0 : index
    %c0_1 = arith.constant 0 : index
    %c0_2 = arith.constant 0 : index
    %3 = vector.load %arg3[%c0, %c0_1, %c0_2] : memref<1x128x128xbf16, #tpu.memory_space<vmem>>, vector<1x128x128xbf16>
    %4 = vector.shape_cast %3 : vector<1x128x128xbf16> to vector<128x128xbf16>
    %c0_3 = arith.constant 0 : index
    %c0_4 = arith.constant 0 : index
    %c0_5 = arith.constant 0 : index
    %5 = vector.load %arg4[%c0_3, %c0_4, %c0_5] : memref<1x512x128xbf16, #tpu.memory_space<vmem>>, vector<1x512x128xbf16>
    %6 = vector.shape_cast %5 : vector<1x512x128xbf16> to vector<512x128xbf16>
    %c0_6 = arith.constant 0 : index
    %c0_7 = arith.constant 0 : index
    %c0_8 = arith.constant 0 : index
    %7 = vector.load %arg5[%c0_6, %c0_7, %c0_8] : memref<1x512x128xbf16, #tpu.memory_space<vmem>>, vector<1x512x128xbf16>
    %8 = vector.shape_cast %7 : vector<1x512x128xbf16> to vector<512x128xbf16>
    %cst = arith.constant dense<0.000000e+00> : vector<128x512xf32>
    %9 = tpu.matmul %4, %6, %cst {dimension_numbers = #tpu.dot_dimension_numbers<[1], [1], [0], [0], [0, 0, 1, 0], [], []>} : vector<128x128xbf16>, vector<512x128xbf16>, vector<128x512xf32> -> vector<128x512xf32>
    %cst_9 = arith.constant dense<0xFF800000> : vector<512xf32>
    %10 = vector.multi_reduction <maximumf>, %9, %cst_9 [0] : vector<128x512xf32> to vector<512xf32>
    %11 = vector.shape_cast %10 : vector<512xf32> to vector<1x512xf32>
    %12 = vector.broadcast %11 : vector<1x512xf32> to vector<128x512xf32>
    %13 = arith.subf %9, %12 : vector<128x512xf32>
    %cst_10 = arith.constant 0.0883883461 : f32
    %14 = vector.broadcast %cst_10 : f32 to vector<128x512xf32>
    %15 = arith.mulf %13, %14 : vector<128x512xf32>
    %16 = math.exp %15 : vector<128x512xf32>
    %cst_11 = arith.constant dense<0.000000e+00> : vector<512xf32>
    %17 = vector.multi_reduction <add>, %16, %cst_11 [0] : vector<128x512xf32> to vector<512xf32>
    %18 = vector.shape_cast %17 : vector<512xf32> to vector<1x512xf32>
    %19 = tpu.reciprocal %18 : vector<1x512xf32> -> vector<1x512xf32>
    %20 = vector.broadcast %19 : vector<1x512xf32> to vector<128x512xf32>
    %21 = arith.mulf %16, %20 : vector<128x512xf32>
    %22 = arith.truncf %21 : vector<128x512xf32> to vector<128x512xbf16>
    %c0_12 = arith.constant 0 : index
    %c0_13 = arith.constant 0 : index
    %23 = vector.load %arg7[%c0_12, %c0_13] : memref<128x128xf32, #tpu.memory_space<vmem>>, vector<128x128xf32>
    %cst_14 = arith.constant dense<0.000000e+00> : vector<128x128xf32>
    %24 = tpu.matmul %22, %8, %cst_14 {dimension_numbers = #tpu.dot_dimension_numbers<[1], [0], [0], [1], [0, 0, 1, 1], [], []>} : vector<128x512xbf16>, vector<512x128xbf16>, vector<128x128xf32> -> vector<128x128xf32>
    %25 = arith.addf %23, %24 : vector<128x128xf32>
    %c0_15 = arith.constant 0 : index
    %c0_16 = arith.constant 0 : index
    %26 = vector.load %arg7[%c0_15, %c0_16] : memref<128x128xf32, #tpu.memory_space<vmem>>, vector<128x128xf32>
    tpu.vector_store %arg7[%c0_15, %c0_16], %25 {strides = array<i32>} : memref<128x128xf32, #tpu.memory_space<vmem>>, vector<128x128xf32>,
    %c0_i32_17 = arith.constant 0 : i32
    %27 = arith.cmpi eq, %arg2, %c0_i32_17 : i32
    %28 = arith.extui %27 : i1 to i32
    %c0_i32_18 = arith.constant 0 : i32
    %29 = arith.cmpi ne, %28, %c0_i32_18 : i32
    scf.if %29 {
      %c0_19 = arith.constant 0 : index
      %c0_20 = arith.constant 0 : index
      %30 = vector.load %arg7[%c0_19, %c0_20] : memref<128x128xf32, #tpu.memory_space<vmem>>, vector<128x128xf32>
      %c0_21 = arith.constant 0 : index
      %c0_22 = arith.constant 0 : index
      %c0_23 = arith.constant 0 : index
      %31 = vector.load %arg6[%c0_21, %c0_22, %c0_23] : memref<1x128x128xf32, #tpu.memory_space<vmem>>, vector<1x128x128xf32>
      %32 = vector.shape_cast %31 : vector<1x128x128xf32> to vector<128x128xf32>
      %33 = vector.shape_cast %30 : vector<128x128xf32> to vector<1x128x128xf32>
      tpu.vector_store %arg6[%c0_21, %c0_22, %c0_23], %33 {strides = array<i32>} : memref<1x128x128xf32, #tpu.memory_space<vmem>>, vector<1x128x128xf32>,
    } else {
    }
    return
  }
  func.func @transform_0(%arg0: i32, %arg1: i32, %arg2: i32) -> (i32, i32, i32) {
    %c0_i32 = arith.constant 0 : i32
    %c0_i32_0 = arith.constant 0 : i32
    %c0_i32_1 = arith.constant 0 : i32
    return %arg0, %c0_i32, %c0_i32_0 : i32, i32, i32
  }
  func.func @transform_1(%arg0: i32, %arg1: i32, %arg2: i32) -> (i32, i32, i32) {
    %c0_i32 = arith.constant 0 : i32
    %c0_i32_0 = arith.constant 0 : i32
    return %arg0, %arg2, %c0_i32 : i32, i32, i32
  }
  func.func @transform_2(%arg0: i32, %arg1: i32, %arg2: i32) -> (i32, i32, i32) {
    %c0_i32 = arith.constant 0 : i32
    return %arg0, %arg2, %arg1 : i32, i32, i32
  }
  func.func @transform_3(%arg0: i32, %arg1: i32, %arg2: i32) -> (i32, i32, i32) {
    %c0_i32 = arith.constant 0 : i32
    %c0_i32_0 = arith.constant 0 : i32
    return %arg0, %c0_i32, %arg1 : i32, i32, i32
  }
}

</mosaic_0001>

<bundles_post_ra>
// kernel: tpu_custom_call.1
= control target key start
LH: loop header
LB: loop body
LE: loop exit
PB: predicated region body
PF: predicated region fallthrough
CT: control target
= control target key end

     0   :  { %s3924_s0 = inlined_call_operand.hbm [shape: bf16[2,128,128], index: 0, kind: input, shape index: {}]   ;;  %s3925_s1 = inlined_call_operand.hbm [shape: bf16[2,512,128], index: 1, kind: input, shape index: {}]   ;;  %s3926_s2 = inlined_call_operand.hbm [shape: bf16[2,512,128], index: 2, kind: input, shape index: {}]   ;;  %s3927_s3 = inlined_call_operand.hbm [shape: f32[2,128,128], index: 3, kind: output, shape index: {}]  }
   0x1   :  { %3965 = sst [smem:[#allocation42_spill]] %s3925_s1 }
   0x2   :  { %8 = vsyncpa [#allocation4], 0 }
   0x3   :  { %10 = vsyncpa [#allocation4 + $0x1], 0 }
   0x4   :  { %11 = vsyncpa [#allocation7], 0 }
   0x5   :  { %13 = vsyncpa [#allocation7 + $0x1], 0 }
   0x6   :  { %14 = vsyncpa [#allocation5], 0 }
   0x7   :  { %16 = vsyncpa [#allocation5 + $0x1], 0  ;;  %s2907_s12 = smov 0   ;;  %s2909_s13 = smov 0  }
   0x8   :  { %s2911_s14 = smov 0   ;;  %s2913_s15 = smov 0  }
   0x9   :  { %s2915_s16 = smov 0   ;;  %s2917_s17 = smov 0  }
   0xa LB: > { %3966 = sst [smem:[#allocation13_spill]] %s2869_s14  ;;  %s2938_s18 = sadd.s32 4294967295, %s2881_s17   ;;  %s2881_s17 = sphi %s2917_s17, %s22_s17   ;;  %s2877_s16 = sphi %s2915_s16, %s4058_s16   ;;  %s2873_s15 = sphi %s2913_s15, %s4057_s15   ;;  %s2869_s14 = sphi %s2911_s14, %s4053_s14   ;;  %s2865_s13 = sphi %s2909_s13, %s4056_s13   ;;  %s2861_s12 = sphi %s2907_s12, %s4055_s12  }
   0xb   : > { %s2107_s19 = sadd.s32 4294967294, %s2881_s17   ;;  %s41_s20 = sadd.s32 1, %s2877_s16 }
   0xc   : > { %s48_s21 = sadd.s32 1, %s2869_s14  ;;  %p43_p0 = scmp.ge.s32.totalorder %s41_s20, 2 }
   0xd   : > { %p55_p1 = scmp.ne.s32.totalorder %s2869_s14, %s2865_s13  ;;  %p56_p2 = scmp.eq.s32.totalorder %s2881_s17, 0 }
   0xe   : > { %p61_p3 = scmp.ne.s32.totalorder %s2865_s13, %s2861_s12  ;;  %s4060_s20 = smov (%p43_p0, %s41_s20), 0 }
   0xf   : > { %3967 = sst [smem:[#allocation14_spill]] %s4060_s20  ;;  %p2950_p4 = por %p56_p2, %p55_p1 }
  0x10   : > { %p62_p5 = scmp.eq.s32.totalorder %s2938_s18, 0  ;;  %s45_s23 = ssub.s32 %s2877_s16, %s4060_s20 }
  0x11   : > { %p145_p6 = scmp.eq.s32.totalorder %s2938_s18, 1  ;;  %p46_p7 = scmp.eq.s32.totalorder %s45_s23, 0 }
  0x12   : > { %p2958_p8 = por %p62_p5, %p61_p3  ;;  %p151_p10 = scmp.eq.s32.totalorder %s2107_s19, 1 }
  0x13   : > { %p2962_p9 = por %p145_p6, %p55_p1  ;;  %p2109_p12 = scmp.ge.s32.totalorder %s2881_s17, 2 }
  0x14   : > { %s2967_s26 = scalar_select %p46_p7, %s2869_s14, %s48_s21  }
  0x15   : > { %p2969_p11 = por %p151_p10, %p61_p3  ;;  %p2515_p13 = scmp.lt.s32.totalorder %s2881_s17, 2 }
  0x16   : > { %3971 = sst [smem:[#allocation15_spill]] %s2967_s26  ;;  %s2976_s28 = sand.u32 1, %s2869_s14  }
  0x17   : > { %p2980_p0 = pnand %p2515_p13, %p2950_p4  ;;  %s193_s30 = sand.u32 1, %s2881_s17  }
  0x18   : > { %s2113_s4 = sshll.u32 %s2976_s28, 8  ;;  %s2418_s5 = sshll.u32 %s2877_s16, 8 }
  0x19   : > { %s197_s6 = scalar_lea.vmem [#allocation6], %s2113_s4  ;;  %s3974_s1 = sld [smem:[#allocation42_spill]] }
  0x1a   : > { %s207_s7 = sshll.u32 %s197_s6, 4  ;;  %s229_s22 = scalar_lea.hbm %s3926_s2, %s2418_s5  ;;  %s208_s7 = int_to_ptr.vmem [resolvable:$true] %s207_s7 }
  0x1b   : > { %s194_s23 = scalar_lea.sflag [#allocation7], %s193_s30  ;;  %s2883_s20 = smov 64  }
  0x1c   : > { %s2884_s26 = smov 4   ;;  %s230_s6 = sshll.u32 %s229_s22, 4  ;;  %s231_s6 = int_to_ptr.hbm [resolvable:$true] %s230_s6 }
  0x1d   : > { %s221_s14 = scalar_lea.vmem [#allocation8], %s2113_s4  ;;  %p2119_p1 = scmp.ge.s32.totalorder %s2881_s17, 1 }
  0x1e   : > { %s232_s8 = sshll.u32 %s221_s14, 4  ;;  %p240_p2 = scmp.lt.s32.totalorder %s2881_s17, 3  ;;  %s233_s8 = int_to_ptr.vmem [resolvable:$true] %s232_s8 }
  0x1f   : > { %s204_s10 = scalar_lea.hbm %s3974_s1, %s2418_s5  ;;  %s2110_s9 = sshll.u32 %s2976_s28, 6 }
  0x20   : > { %s205_s11 = sshll.u32 %s204_s10, 4  ;;  %p241_p3 = pnand %p2119_p1, %p240_p2  ;;  %s206_s11 = int_to_ptr.hbm [resolvable:$true] %s205_s11 }
  0x21   : > { %2507 = dma.hbm_to_vmem [thread:$0]  (!%p2980_p0), %s206_s11, 4096, %s208_s7, %s194_s23, %s2883_s20, %s2883_s20, %s2884_s26  }
  0x22   : > { %s2417_s10 = sshll.u32 %s2877_s16, 6  ;;  %s175_s1 = scalar_lea.vmem [#allocation3], %s2110_s9 }
  0x23   : > { %s180_s30 = scalar_lea.hbm %s3924_s0, %s2417_s10  ;;  %s183_s7 = sshll.u32 %s175_s1, 4  ;;  %s184_s7 = int_to_ptr.vmem [resolvable:$true] %s183_s7 }
  0x24   : > { %s181_s21 = sshll.u32 %s180_s30, 4  ;;  %s172_s4 = scalar_lea.sflag [#allocation4], %s2976_s28  ;;  %s182_s21 = int_to_ptr.hbm [resolvable:$true] %s181_s21 }
  0x25   : > { %2504 = dma.hbm_to_vmem [thread:$0]  (!%p2980_p0), %s182_s21, 1024, %s184_s7, %s172_s4, %s2883_s20, %s2883_s20, %s2884_s26  }
  0x26   : > { %2510 = dma.hbm_to_vmem [thread:$0]  (!%p2980_p0), %s231_s6, 4096, %s233_s8, %s194_s23, %s2883_s20, %s2883_s20, %s2884_s26  }
  0x27   : > { %244 = sbr.rel (%p241_p3) target bundleno = 777 (0x309), region = 32 }
  0x2c   : > { %s3008_s14 = sand.u32 1, %s2865_s13  }
  0x2d   : > { %s2120_s11 = sshll.u32 %s3008_s14, 6  ;;  %s247_s22 = scalar_lea.sflag [#allocation4], %s3008_s14 }
  0x2e   : > { %s3012_s10 = scalar_lea.vmem [#allocation3], %s2120_s11 }
  0x2f   : > { %2848 = dma.done.wait (%p2958_p8), %s247_s22, 1024  }
  0x30   : > { %2850 = vsyncadd (%p2958_p8), %s247_s22, 4294966272  ;;  %s256_s1 = sand.u32 1, %s2938_s18   ;;  %s2121_s20 = sshll.u32 %s3008_s14, 8 }
  0x31   : > { %s257_s26 = scalar_lea.sflag [#allocation7], %s256_s1  ;;  %s3022_s28 = scalar_lea.vmem [#allocation6], %s2121_s20 }
  0x32   : > { %2852 = dma.done.wait (%p2958_p8), %s257_s26, 8192  }
  0x33   : > { %2854 = vsyncadd (%p2958_p8), %s257_s26, 4294959104  ;;  %v2435_v0 = vld [vmem:[%s3022_s28 + $0x38] sm:$0xff]  ;;  %v2434_v4 = vld [vmem:[%s3022_s28 + $0x30] sm:$0xff]  ;;  %s3124_s18 = scalar_lea.vmem [#allocation8], %s2121_s20  ;;  %s2123_s24 = sshll.u32 %s3008_s14, 7 }
  0x34   : > { %v2443_v1 = vld [vmem:[%s3022_s28 + $0x78] sm:$0xff]  ;;  %710 = vmatpush.bf16.xpose.msra.mxu0 %v2435_v0  ;;  %v2442_v5 = vld [vmem:[%s3022_s28 + $0x70] sm:$0xff]  ;;  %v2433_v8 = vld [vmem:[%s3022_s28 + $0x28] sm:$0xff]  ;;  %s3867_s29 = scalar_lea.vmem [#allocation9], %s2123_s24  ;;  %s2492_s23 = sshll.u32 %s2873_s15, 7 }
  0x35   : > { %v2451_v2 = vld [vmem:[%s3022_s28 + $0xb8] sm:$0xff]  ;;  %759 = vmatpush.bf16.xpose.msra.mxu1 %v2443_v1  ;;  %v2450_v6 = vld [vmem:[%s3022_s28 + $0xb0] sm:$0xff]  ;;  %v2441_v9 = vld [vmem:[%s3022_s28 + $0x68] sm:$0xff]  ;;  %s1966_s9 = scalar_lea.hbm %s3927_s3, %s2492_s23  ;;  %s1967_s19 = sshll.u32 %s3867_s29, 4  ;;  %s1968_s19 = int_to_ptr.vmem [resolvable:$true] %s1967_s19 }
  0x36   : > { %v2459_v3 = vld [vmem:[%s3022_s28 + $0xf8] sm:$0xff]  ;;  %808 = vmatpush.bf16.xpose.msra.mxu2 %v2451_v2  ;;  %v2458_v7 = vld [vmem:[%s3022_s28 + $0xf0] sm:$0xff]  ;;  %v2449_v10 = vld [vmem:[%s3022_s28 + $0xa8] sm:$0xff]  ;;  %s1969_s5 = sshll.u32 %s1966_s9, 4  ;;  %s1954_s15 = scalar_lea.sflag [#allocation5], %s3008_s14  ;;  %s1970_s5 = int_to_ptr.hbm [resolvable:$true] %s1969_s5 }
  0x37   : > { %857 = vmatpush.bf16.xpose.msra.mxu3 %v2459_v3  ;;  %v2457_v11 = vld [vmem:[%s3022_s28 + $0xe8] sm:$0xff]  ;;  %v2432_v12 = vld [vmem:[%s3022_s28 + $0x20] sm:$0xff]  ;;  %v2431_v16 = vld [vmem:[%s3022_s28 + $0x18] sm:$0xff]  ;;  %s2809_s30 = sshra.s32 %s1970_s5, 4  ;;  %s2815_s11 = scalar_lea.hbm %s3927_s3, 256  ;;  %s2810_s30 = int_to_ptr.hbm [resolvable:$true] %s2809_s30 }
  0x38   : > { %v2440_v13 = vld [vmem:[%s3022_s28 + $0x60] sm:$0xff]  ;;  %v2439_v17 = vld [vmem:[%s3022_s28 + $0x58] sm:$0xff]  ;;  %v2430_v20 = vld [vmem:[%s3022_s28 + $0x10] sm:$0xff]  ;;  %s2811_s21 = scalar_lea.hbm %s2810_s30, 128  ;;  %p2816_p7 = scmp.lt.s32.totalorder %s2810_s30, %s3927_s3 }
  0x39   : > { %v2448_v14 = vld [vmem:[%s3022_s28 + $0xa0] sm:$0xff]  ;;  %v2447_v18 = vld [vmem:[%s3022_s28 + $0x98] sm:$0xff]  ;;  %v2438_v21 = vld [vmem:[%s3022_s28 + $0x50] sm:$0xff]  ;;  %p2812_p4 = scmp.ne.s32.totalorder %s2810_s30, %s2811_s21  ;;  %p2817_p8 = scmp.lt.s32.totalorder %s2815_s11, %s2811_s21 }
  0x3a   : > { %v2456_v15 = vld [vmem:[%s3022_s28 + $0xe0] sm:$0xff]  ;;  %v2455_v19 = vld [vmem:[%s3022_s28 + $0xd8] sm:$0xff]  ;;  %v2446_v22 = vld [vmem:[%s3022_s28 + $0x90] sm:$0xff] }
  0x3b   : > { %v2454_v23 = vld [vmem:[%s3022_s28 + $0xd0] sm:$0xff]  ;;  %v2429_v24 = vld [vmem:[%s3022_s28 + $0x8] sm:$0xff]  ;;  %v2428_v28 = vld [vmem:[%s3022_s28] sm:$0xff]  ;;  %p2813_p5 = pnand %p2812_p4, %p2962_p9  ;;  %p2818_p10 = por %p2817_p8, %p2816_p7 }
  0x3c   : > { %711 = vmatpush.bf16.xpose.msra.mxu0 %v2434_v4  ;;  %v2437_v25 = vld [vmem:[%s3022_s28 + $0x48] sm:$0xff]  ;;  %v2436_v29 = vld [vmem:[%s3022_s28 + $0x40] sm:$0xff]  ;;  %v2422_v34 = vld [vmem:[%s3012_s10 + $0x10] sm:$0xff] }
  0x3d   : > { %760 = vmatpush.bf16.xpose.msra.mxu1 %v2442_v5  ;;  %v2445_v26 = vld [vmem:[%s3022_s28 + $0x88] sm:$0xff]  ;;  %v2444_v30 = vld [vmem:[%s3022_s28 + $0x80] sm:$0xff]  ;;  %v2423_v35 = vld [vmem:[%s3012_s10 + $0x18] sm:$0xff]  ;;  %p2814_p6 = pneg %p2813_p5 }
  0x3e   : > { %809 = vmatpush.bf16.xpose.msra.mxu2 %v2450_v6  ;;  %v2453_v27 = vld [vmem:[%s3022_s28 + $0xc8] sm:$0xff]  ;;  %v2452_v31 = vld [vmem:[%s3022_s28 + $0xc0] sm:$0xff]  ;;  %v2426_v38 = vld [vmem:[%s3012_s10 + $0x30] sm:$0xff] }
  0x3f   : > { %858 = vmatpush.bf16.xpose.msra.mxu3 %v2458_v7  ;;  %v2420_v32 = vld [vmem:[%s3012_s10] sm:$0xff]  ;;  %v2421_v33 = vld [vmem:[%s3012_s10 + $0x8] sm:$0xff]  ;;  %v2427_v39 = vld [vmem:[%s3012_s10 + $0x38] sm:$0xff]  ;;  %p2819_p13 = pnand %p2818_p10, %p2814_p6 }
  0x40   : > { %v2424_v36 = vld [vmem:[%s3012_s10 + $0x20] sm:$0xff]  ;;  %v2425_v37 = vld [vmem:[%s3012_s10 + $0x28] sm:$0xff]  ;;  %v2483_v3 = vld [vmem:[%s3124_s18 + $0xb8] sm:$0xff] }
  0x41   : > { %v2491_v4 = vld [vmem:[%s3124_s18 + $0xf8] sm:$0xff] }
  0x42   : > { %v2467_v5 = vld [vmem:[%s3124_s18 + $0x38] sm:$0xff] }
  0x43   : > { %v2475_v6 = vld [vmem:[%s3124_s18 + $0x78] sm:$0xff] }
  0x44   : > { %712 = vmatpush.bf16.xpose.msra.mxu0 %v2433_v8 }
  0x45   : > { %761 = vmatpush.bf16.xpose.msra.mxu1 %v2441_v9 }
  0x46   : > { %810 = vmatpush.bf16.xpose.msra.mxu2 %v2449_v10 }
  0x47   : > { %859 = vmatpush.bf16.xpose.msra.mxu3 %v2457_v11 }
  0x4c   : > { %713 = vmatpush.bf16.xpose.msra.mxu0 %v2432_v12 }
  0x4d   : > { %762 = vmatpush.bf16.xpose.msra.mxu1 %v2440_v13 }
  0x4e   : > { %811 = vmatpush.bf16.xpose.msra.mxu2 %v2448_v14  ;;  %v2482_v14 = vld [vmem:[%s3124_s18 + $0xb0] sm:$0xff] }
  0x4f   : > { %860 = vmatpush.bf16.xpose.msra.mxu3 %v2456_v15  ;;  %v2490_v15 = vld [vmem:[%s3124_s18 + $0xf0] sm:$0xff] }
  0x54   : > { %714 = vmatpush.bf16.xpose.msra.mxu0 %v2431_v16  ;;  %v2466_v16 = vld [vmem:[%s3124_s18 + $0x30] sm:$0xff] }
  0x55   : > { %763 = vmatpush.bf16.xpose.msra.mxu1 %v2439_v17  ;;  %v2474_v17 = vld [vmem:[%s3124_s18 + $0x70] sm:$0xff] }
  0x56   : > { %812 = vmatpush.bf16.xpose.msra.mxu2 %v2447_v18 }
  0x57   : > { %861 = vmatpush.bf16.xpose.msra.mxu3 %v2455_v19 }
  0x5c   : > { %715 = vmatpush.bf16.xpose.msra.mxu0 %v2430_v20 }
  0x5d   : > { %764 = vmatpush.bf16.xpose.msra.mxu1 %v2438_v21 }
  0x5e   : > { %813 = vmatpush.bf16.xpose.msra.mxu2 %v2446_v22 }
  0x5f   : > { %862 = vmatpush.bf16.xpose.msra.mxu3 %v2454_v23 }
  0x64   : > { %716 = vmatpush.bf16.xpose.msra.mxu0 %v2429_v24 }
  0x65   : > { %765 = vmatpush.bf16.xpose.msra.mxu1 %v2437_v25 }
  0x66   : > { %814 = vmatpush.bf16.xpose.msra.mxu2 %v2445_v26 }
  0x67   : > { %863 = vmatpush.bf16.xpose.msra.mxu3 %v2453_v27 }
  0x6c   : > { %717 = vmatpush.bf16.xpose.msra.mxu0 %v2428_v28 }
  0x6d   : > { %766 = vmatpush.bf16.xpose.msra.mxu1 %v2436_v29 }
  0x6e   : > { %815 = vmatpush.bf16.xpose.msra.mxu2 %v2444_v30 }
  0x6f   : > { %864 = vmatpush.bf16.xpose.msra.mxu3 %v2452_v31 }
  0x73   : > { %718 = vmatmul.bf16.vlgmr.msra.gmra.mxu0 %v2420_v32 }
  0x74   : > { %767 = vmatmul.bf16.vlgmr.msra.gmra.mxu1 %v2420_v32  ;;  %1690 = vmatpush.bf16.msrb.mxu0 %v2467_v5 }
  0x75   : > { %816 = vmatmul.bf16.vlgmr.msra.gmra.mxu2 %v2420_v32  ;;  %1739 = vmatpush.bf16.msrb.mxu1 %v2475_v6 }
  0x76   : > { %865 = vmatmul.bf16.vlgmr.msra.gmra.mxu3 %v2420_v32  ;;  %1788 = vmatpush.bf16.msrb.mxu2 %v2483_v3 }
  0x77   : > { %1837 = vmatpush.bf16.msrb.mxu3 %v2491_v4 }
  0x78   : > { %1691 = vmatpush.bf16.msrb.mxu0 %v2466_v16 }
  0x79   : > { %1740 = vmatpush.bf16.msrb.mxu1 %v2474_v17 }
  0x7a   : > { %1789 = vmatpush.bf16.msrb.mxu2 %v2482_v14 }
  0x7b   : > { %1838 = vmatpush.bf16.msrb.mxu3 %v2490_v15 }
  0x83   : > { %723 = vmatmul.bf16.gmra.mxu0 %v2421_v33 }
  0x84   : > { %772 = vmatmul.bf16.gmra.mxu1 %v2421_v33 }
  0x85   : > { %821 = vmatmul.bf16.gmra.mxu2 %v2421_v33 }
  0x86   : > { %870 = vmatmul.bf16.gmra.mxu3 %v2421_v33 }
  0x93   : > { %728 = vmatmul.bf16.gmra.mxu0 %v2422_v34 }
  0x94   : > { %777 = vmatmul.bf16.gmra.mxu1 %v2422_v34 }
  0x95   : > { %826 = vmatmul.bf16.gmra.mxu2 %v2422_v34 }
  0x96   : > { %875 = vmatmul.bf16.gmra.mxu3 %v2422_v34 }
  0xa3   : > { %733 = vmatmul.bf16.gmra.mxu0 %v2423_v35 }
  0xa4   : > { %782 = vmatmul.bf16.gmra.mxu1 %v2423_v35 }
  0xa5   : > { %831 = vmatmul.bf16.gmra.mxu2 %v2423_v35 }
  0xa6   : > { %880 = vmatmul.bf16.gmra.mxu3 %v2423_v35 }
  0xb3   : > { %738 = vmatmul.bf16.gmra.mxu0 %v2424_v36 }
  0xb4   : > { %787 = vmatmul.bf16.gmra.mxu1 %v2424_v36 }
  0xb5   : > { %836 = vmatmul.bf16.gmra.mxu2 %v2424_v36 }
  0xb6   : > { %885 = vmatmul.bf16.gmra.mxu3 %v2424_v36 }
  0xc3   : > { %743 = vmatmul.bf16.gmra.mxu0 %v2425_v37 }
  0xc4   : > { %792 = vmatmul.bf16.gmra.mxu1 %v2425_v37 }
  0xc5   : > { %841 = vmatmul.bf16.gmra.mxu2 %v2425_v37 }
  0xc6   : > { %890 = vmatmul.bf16.gmra.mxu3 %v2425_v37 }
  0xd3   : > { %748 = vmatmul.bf16.gmra.mxu0 %v2426_v38 }
  0xd4   : > { %797 = vmatmul.bf16.gmra.mxu1 %v2426_v38 }
  0xd5   : > { %846 = vmatmul.bf16.gmra.mxu2 %v2426_v38 }
  0xd6   : > { %895 = vmatmul.bf16.gmra.mxu3 %v2426_v38 }
  0xe3   : > { %753 = vmatmul.bf16.gmra.mxu0 %v2427_v39 }
  0xe4   : > { %802 = vmatmul.bf16.gmra.mxu1 %v2427_v39 }
  0xe5   : > { %851 = vmatmul.bf16.gmra.mxu2 %v2427_v39 }
  0xe6   : > { %900 = vmatmul.bf16.gmra.mxu3 %v2427_v39 }
  0xf0   : > { %v3068_v40 = vpop.f32.mrf.mxu0 }
  0xf1   : > { %v3070_v41 = vpop.f32.mrf.mxu1 }
  0xf8   : > { %v3072_v42 = vpop.f32.mrf.mxu2  ;;  %v3074_v43 = vpop.f32.mrf.mxu0 }
  0xf9   : > { %3975 = vst [vmem:[#allocation16_spill] sm:$0xff] %v3072_v42  ;;  %v3076_v44 = vpop.f32.mrf.mxu1  ;;  %v3090_v51 = vpop.f32.mrf.mxu3  ;;  %v906_v25 = vmax.f32 %v3068_v40, %v3074_v43 }
  0xfa   : > { %3978 = vst [vmem:[#allocation19_spill] sm:$0xff] %v3090_v51  ;;  %v927_v27 = vmax.f32 %v3070_v41, %v3076_v44 }
 0x100   : > { %v3078_v45 = vpop.f32.mrf.mxu2  ;;  %v3080_v46 = vpop.f32.mrf.mxu0 }
 0x101   : > { %3976 = vst [vmem:[#allocation17_spill] sm:$0xff] %v3078_v45  ;;  %v3082_v47 = vpop.f32.mrf.mxu1  ;;  %v3098_v55 = vpop.f32.mrf.mxu3  ;;  %v907_v28 = vmax.f32 %v906_v25, %v3080_v46 }
 0x102   : > { %3980 = vst [vmem:[#allocation21_spill] sm:$0xff] %v3098_v55  ;;  %v928_v30 = vmax.f32 %v927_v27, %v3082_v47 }
 0x108   : > { %v3084_v48 = vpop.f32.mrf.mxu2  ;;  %v3086_v49 = vpop.f32.mrf.mxu0 }
 0x109   : > { %3977 = vst [vmem:[#allocation18_spill] sm:$0xff] %v3084_v48  ;;  %v3088_v50 = vpop.f32.mrf.mxu1  ;;  %v3106_v59 = vpop.f32.mrf.mxu3  ;;  %v908_v33 = vmax.f32 %v907_v28, %v3086_v49 }
 0x10a   : > { %v929_v34 = vmax.f32 %v928_v30, %v3088_v50 }
 0x110   : > { %v3092_v52 = vpop.f32.mrf.mxu2  ;;  %v3094_v53 = vpop.f32.mrf.mxu0 }
 0x111   : > { %3979 = vst [vmem:[#allocation20_spill] sm:$0xff] %v3092_v52  ;;  %v3096_v54 = vpop.f32.mrf.mxu1  ;;  %v3114_v63 = vpop.f32.mrf.mxu3  ;;  %v909_v35 = vmax.f32 %v908_v33, %v3094_v53 }
 0x112   : > { %v930_v36 = vmax.f32 %v929_v34, %v3096_v54 }
 0x118   : > { %v3100_v56 = vpop.f32.mrf.mxu2  ;;  %v3102_v57 = vpop.f32.mrf.mxu0 }
 0x119   : > { %3981 = vst [vmem:[#allocation22_spill] sm:$0xff] %v3100_v56  ;;  %v3104_v58 = vpop.f32.mrf.mxu1  ;;  %v3136_v10 = vpop.f32.mrf.mxu3  ;;  %v910_v37 = vmax.f32 %v909_v35, %v3102_v57 }
 0x11a   : > { %v931_v38 = vmax.f32 %v930_v36, %v3104_v58 }
 0x120   : > { %v3108_v60 = vpop.f32.mrf.mxu2  ;;  %v3110_v61 = vpop.f32.mrf.mxu0 }
 0x121   : > { %v3112_v62 = vpop.f32.mrf.mxu1  ;;  %v3148_v18 = vpop.f32.mrf.mxu3  ;;  %v911_v39 = vmax.f32 %v910_v37, %v3110_v61 }
 0x122   : > { %v932_v4 = vmax.f32 %v931_v38, %v3112_v62 }
 0x128   : > { %v3116_v0 = vpop.f32.mrf.mxu2  ;;  %v3118_v1 = vpop.f32.mrf.mxu0 }
 0x129   : > { %v3120_v2 = vpop.f32.mrf.mxu1  ;;  %v3156_v22 = vpop.f32.mrf.mxu3  ;;  %v912_v14 = vmax.f32 %v911_v39, %v3118_v1 }
 0x12a   : > { %v933_v16 = vmax.f32 %v932_v4, %v3120_v2 }
 0x130   : > { %v3130_v7 = vpop.f32.mrf.mxu2  ;;  %v3132_v8 = vpop.f32.mrf.mxu0 }
 0x131   : > { %v3134_v9 = vpop.f32.mrf.mxu1  ;;  %v3169_v29 = vpop.f32.mrf.mxu3  ;;  %v913_v17 = vmax.f32 %v912_v14, %v3132_v8 }
 0x132   : > { %3983 = vst [vmem:[#allocation24_spill] sm:$0xff] %v3169_v29  ;;  %v934_v25 = vmax.f32 %v933_v16, %v3134_v9 }
 0x138   : > { %v3138_v11 = vpop.f32.mrf.mxu0  ;;  %v3142_v13 = vpop.f32.mrf.mxu2 }
 0x139   : > { %v3140_v12 = vpop.f32.mrf.mxu1  ;;  %v3191_v15 = vpop.f32.mrf.mxu3  ;;  %v914_v27 = vmax.f32 %v913_v17, %v3138_v11  ;;  %v948_v17 = vmax.f32 %v3072_v42, %v3078_v45 }
 0x13a   : > { %v935_v28 = vmax.f32 %v934_v25, %v3140_v12 }
 0x140   : > { %v3150_v19 = vpop.f32.mrf.mxu0  ;;  %v3154_v21 = vpop.f32.mrf.mxu2 }
 0x141   : > { %v3152_v20 = vpop.f32.mrf.mxu1  ;;  %v915_v30 = vmax.f32 %v914_v27, %v3150_v19  ;;  %v3208_v39 = vpop.f32.mrf.mxu3 }
 0x142   : > { %v936_v33 = vmax.f32 %v935_v28, %v3152_v20  ;;  %v949_v28 = vmax.f32 %v948_v17, %v3084_v48 }
 0x148   : > { %v3158_v23 = vpop.f32.mrf.mxu0  ;;  %v3164_v26 = vpop.f32.mrf.mxu2 }
 0x149   : > { %v3160_v24 = vpop.f32.mrf.mxu1  ;;  %v916_v36 = vmax.f32 %v915_v30, %v3158_v23 }
 0x14a   : > { %3982 = vst [vmem:[#allocation23_spill] sm:$0xff] %v3160_v24  ;;  %v937_v38 = vmax.f32 %v936_v33, %v3160_v24 }
 0x150   : > { %v3172_v31 = vpop.f32.mrf.mxu0  ;;  %v3183_v3 = vpop.f32.mrf.mxu2 }
 0x151   : > { %v3174_v32 = vpop.f32.mrf.mxu1  ;;  %v917_v4 = vmax.f32 %v916_v36, %v3172_v31 }
 0x152   : > { %3984 = vst [vmem:[#allocation25_spill] sm:$0xff] %v3174_v32  ;;  %v938_v14 = vmax.f32 %v937_v38, %v3174_v32  ;;  %v950_v38 = vmax.f32 %v949_v28, %v3092_v52 }
 0x158   : > { %v3186_v5 = vpop.f32.mrf.mxu0  ;;  %v3205_v37 = vpop.f32.mrf.mxu2 }
 0x159   : > { %v3188_v6 = vpop.f32.mrf.mxu1  ;;  %v918_v16 = vmax.f32 %v917_v4, %v3186_v5 }
 0x15a   : > { %v939_v25 = vmax.f32 %v938_v14, %v3188_v6  ;;  %v951_v14 = vmax.f32 %v950_v38, %v3100_v56 }
 0x15c   : > { %v952_v48 = vmax.f32 %v951_v14, %v3108_v60 }
 0x15e   : > { %v953_v28 = vmax.f32 %v952_v48, %v3116_v0 }
 0x160   : > { %v3200_v34 = vpop.f32.mrf.mxu0  ;;  %v3226_v32 = vpop.f32.mrf.mxu2 }
 0x161   : > { %v3202_v35 = vpop.f32.mrf.mxu1  ;;  %v919_v27 = vmax.f32 %v918_v16, %v3200_v34  ;;  %v3229_v16 = vpop.f32.mrf.mxu3 }
 0x162   : > { %3985 = vst [vmem:[#allocation26_spill] sm:$0xff] %v3202_v35  ;;  %v940_v30 = vmax.f32 %v939_v25, %v3202_v35  ;;  %v969_v25 = vmax.f32 %v3090_v51, %v3098_v55 }
 0x168   : > { %v3219_v33 = vpop.f32.mrf.mxu0  ;;  %v3240_v55 = vpop.f32.mrf.mxu2 }
 0x169   : > { %v3221_v24 = vpop.f32.mrf.mxu1  ;;  %v920_v36 = vmax.f32 %v919_v27, %v3219_v33  ;;  %v970_v27 = vmax.f32 %v969_v25, %v3106_v59 }
 0x16a   : > { %3986 = vst [vmem:[#allocation27_spill] sm:$0xff] %v3221_v24  ;;  %v941_v4 = vmax.f32 %v940_v30, %v3221_v24  ;;  %v954_v24 = vmax.f32 %v953_v28, %v3130_v7 }
 0x16b   : > { %v921_v45 = vrot.slane %v920_v36, 4  ;;  %v971_v52 = vmax.f32 %v970_v27, %v3114_v63 }
 0x16c   : > { %v942_v42 = vrot.slane %v941_v4, 4 }
 0x16d   : > { %v922_v17 = vmax.f32 %v920_v36, %v921_v45  ;;  %v972_v45 = vmax.f32 %v971_v52, %v3136_v10  ;;  %v955_v36 = vmax.f32 %v954_v24, %v3142_v13 }
 0x16e   : > { %v943_v38 = vmax.f32 %v941_v4, %v942_v42 }
 0x16f   : > { %v923_v35 = vrot.slane %v922_v17, 2  ;;  %v973_v51 = vmax.f32 %v972_v45, %v3148_v18  ;;  %v956_v25 = vmax.f32 %v955_v36, %v3154_v21 }
 0x170   : > { %v944_v48 = vrot.slane %v943_v38, 2 }
 0x171   : > { %v924_v30 = vmax.f32 %v922_v17, %v923_v35  ;;  %v3246_v35 = vpop.f32.mrf.mxu3  ;;  %v974_v17 = vmax.f32 %v973_v51, %v3156_v22  ;;  %v957_v42 = vmax.f32 %v956_v25, %v3164_v26 }
 0x172   : > { %v945_v28 = vmax.f32 %v943_v38, %v944_v48 }
 0x173   : > { %v925_v56 = vrot.slane %v924_v30, 1  ;;  %v975_v4 = vmax.f32 %v974_v17, %v3169_v29  ;;  %v958_v27 = vmax.f32 %v957_v42, %v3183_v3 }
 0x174   : > { %v946_v29 = vrot.slane %v945_v28, 1 }
 0x175   : > { %v3242_v14 = vmax.f32 %v924_v30, %v925_v56  ;;  %v976_v51 = vmax.f32 %v975_v4, %v3191_v15  ;;  %v959_v45 = vmax.f32 %v958_v27, %v3205_v37 }
 0x177   : > { %v990_v52 = vsub.f32 %v3068_v40, %v3242_v14  ;;  %v994_v24 = vsub.f32 %v3074_v43, %v3242_v14  ;;  %v998_v56 = vsub.f32 %v3080_v46, %v3242_v14  ;;  %v1002_v30 = vsub.f32 %v3086_v49, %v3242_v14  ;;  %v3268_v49 = vpop.f32.mrf.mxu2 }
 0x178   : > { %v1006_v43 = vsub.f32 %v3094_v53, %v3242_v14  ;;  %v977_v46 = vmax.f32 %v976_v51, %v3208_v39  ;;  %v960_v17 = vmax.f32 %v959_v45, %v3226_v32  ;;  %v1010_v38 = vsub.f32 %v3102_v57, %v3242_v14 }
 0x179   : > { %v1054_v36 = vmul.f32 0.088388346, %v990_v52  ;;  %v1058_v40 = vmul.f32 0.088388346, %v994_v24  ;;  %v1062_v25 = vmul.f32 0.088388346, %v998_v56  ;;  %v3272_v27 = vpop.f32.mrf.mxu3  ;;  %v1014_v53 = vsub.f32 %v3110_v61, %v3242_v14 }
 0x17a   : > { %v1066_v48 = vmul.f32 0.088388346, %v1002_v30  ;;  %v978_v42 = vmax.f32 %v977_v46, %v3229_v16  ;;  %v961_v52 = vmax.f32 %v960_v17, %v3240_v55  ;;  %v1070_v56 = vmul.f32 0.088388346, %v1006_v43 }
 0x17b   : > { %v1118_v24 = vmul.f32 1.442695, %v1054_v36  ;;  %v1126_v4 = vmul.f32 1.442695, %v1058_v40  ;;  %v1134_v51 = vmul.f32 1.442695, %v1062_v25  ;;  %v3277_v57 = vmax.f32 %v945_v28, %v946_v29 }
 0x17c   : > { %v979_v45 = vmax.f32 %v978_v42, %v3246_v35  ;;  %v3280_v30 = vmax.f32 %v961_v52, %v3268_v49  ;;  %v1018_v46 = vsub.f32 %v3118_v1, %v3242_v14  ;;  %v1074_v36 = vmul.f32 0.088388346, %v1010_v38 }
 0x17d   : > { %2569 = vpow2.f32 %v1118_v24  ;;  %v1142_v40 = vmul.f32 1.442695, %v1066_v48  ;;  %v1022_v61 = vsub.f32 %v3132_v8, %v3242_v14  ;;  %v1026_v43 = vsub.f32 %v3138_v11, %v3242_v14 }
 0x17e   : > { %2571 = vpow2.f32 %v1126_v4  ;;  %v3285_v17 = vmax.f32 %v979_v45, %v3272_v27  ;;  %v1078_v29 = vmul.f32 0.088388346, %v1014_v53  ;;  %v1150_v28 = vmul.f32 1.442695, %v1070_v56 }
 0x17f   : > { %2573 = vpow2.f32 %v1134_v51  ;;  %v1030_v25 = vsub.f32 %v3150_v19, %v3242_v14  ;;  %v1034_v1 = vsub.f32 %v3158_v23, %v3242_v14  ;;  %v991_v38 = vsub.f32 %v3070_v41, %v3277_v57 }
 0x180   : > { %v1082_v42 = vmul.f32 0.088388346, %v1018_v46  ;;  %2575 = vpow2.f32 %v1142_v40  ;;  %v1158_v8 = vmul.f32 1.442695, %v1074_v36  ;;  %v995_v11 = vsub.f32 %v3076_v44, %v3277_v57 }
 0x181   : > { %v1038_v24 = vsub.f32 %v3172_v31, %v3242_v14  ;;  %v1042_v19 = vsub.f32 %v3186_v5, %v3242_v14  ;;  %v1046_v23 = vsub.f32 %v3200_v34, %v3242_v14  ;;  %v1086_v41 = vmul.f32 0.088388346, %v1022_v61  ;;  %v3320_v46 = vpop.f32.mrf.mxu3 }
 0x182   : > { %v1090_v53 = vmul.f32 0.088388346, %v1026_v43  ;;  %2577 = vpow2.f32 %v1150_v28  ;;  %v1166_v56 = vmul.f32 1.442695, %v1078_v29  ;;  %v999_v44 = vsub.f32 %v3082_v47, %v3277_v57 }
 0x183   : > { %v3300_v52 = vpop.eup %2569  ;;  %v1050_v51 = vsub.f32 %v3219_v33, %v3242_v14  ;;  %v1094_v45 = vmul.f32 0.088388346, %v1030_v25  ;;  %v1003_v5 = vsub.f32 %v3088_v50, %v3277_v57  ;;  %2579 = vpow2.f32 %v1158_v8 }
 0x184   : > { %v3308_v4 = vpop.eup %2571  ;;  %v1174_v36 = vmul.f32 1.442695, %v1082_v42  ;;  %v1055_v40 = vmul.f32 0.088388346, %v991_v38  ;;  %v1059_v61 = vmul.f32 0.088388346, %v995_v11  ;;  %2581 = vpow2.f32 %v1166_v56 }
 0x185   : > { %3987 = vst [vmem:[#allocation28_spill] sm:$0xff] %v3308_v4  ;;  %v1246_v31 = vadd.f32 %v3308_v4, %v3300_v52  ;;  %v3318_v34 = vpop.eup %2573  ;;  %v1098_v43 = vmul.f32 0.088388346, %v1034_v1  ;;  %v1102_v47 = vmul.f32 0.088388346, %v1038_v24  ;;  %v1007_v50 = vsub.f32 %v3096_v54, %v3277_v57 }
 0x186   : > { %v1182_v29 = vmul.f32 1.442695, %v1086_v41  ;;  %v3323_v14 = vpop.eup %2575  ;;  %v1190_v28 = vmul.f32 1.442695, %v1090_v53  ;;  %v1063_v25 = vmul.f32 0.088388346, %v999_v44  ;;  %v1011_v38 = vsub.f32 %v3104_v58, %v3277_v57 }
 0x187   : > { %v1247_v33 = vadd.f32 %v3318_v34, %v1246_v31  ;;  %v1106_v48 = vmul.f32 0.088388346, %v1042_v19  ;;  %v1110_v4 = vmul.f32 0.088388346, %v1046_v23  ;;  %2583 = vpow2.f32 %v1174_v36 }
 0x188   : > { %v3330_v1 = vpop.eup %2577  ;;  %v1067_v42 = vmul.f32 0.088388346, %v1003_v5  ;;  %v1120_v11 = vmul.f32 1.442695, %v1055_v40  ;;  %v1128_v24 = vmul.f32 1.442695, %v1059_v61  ;;  %2585 = vpow2.f32 %v1182_v29 }
 0x189   : > { %v1248_v8 = vadd.f32 %v3323_v14, %v1247_v33  ;;  %v1114_v41 = vmul.f32 0.088388346, %v1050_v51  ;;  %v1198_v53 = vmul.f32 1.442695, %v1094_v45  ;;  %v3333_v54 = vpop.eup %2579  ;;  %2587 = vpow2.f32 %v1190_v28 }
 0x18a   : > { %v1015_v19 = vsub.f32 %v3112_v62, %v3277_v57  ;;  %v1071_v23 = vmul.f32 0.088388346, %v1007_v50  ;;  %v1136_v44 = vmul.f32 1.442695, %v1063_v25  ;;  %v1206_v58 = vmul.f32 1.442695, %v1098_v43  ;;  %v3338_v5 = vpop.eup %2581 }
 0x18b   : > { %v1249_v56 = vadd.f32 %v3330_v1, %v1248_v8  ;;  %v1214_v31 = vmul.f32 1.442695, %v1102_v47  ;;  %2589 = vpow2.f32 %v1120_v11  ;;  %3988 = vst [vmem:[#allocation29_spill] sm:$0xff] %v3338_v5  ;;  %v1019_v51 = vsub.f32 %v3120_v2, %v3277_v57  ;;  %v3347_v47 = vpop.f32.mrf.mxu3 }
 0x18c   : > { %v1075_v45 = vmul.f32 0.088388346, %v1011_v38  ;;  %2591 = vpow2.f32 %v1128_v24  ;;  %v1144_v40 = vmul.f32 1.442695, %v1067_v42  ;;  %v1222_v61 = vmul.f32 1.442695, %v1106_v48 }
 0x18d   : > { %v1250_v36 = vadd.f32 %v3333_v54, %v1249_v56  ;;  %2593 = vpow2.f32 %v1198_v53  ;;  %v1023_v62 = vsub.f32 %v3134_v9, %v3277_v57  ;;  %v3345_v43 = vpop.eup %2583  ;;  %v1079_v33 = vmul.f32 0.088388346, %v1015_v19 }
 0x18e   : > { %3989 = vst [vmem:[#allocation30_spill] sm:$0xff] %v3345_v43  ;;  %2595 = vpow2.f32 %v1136_v44  ;;  %v1152_v28 = vmul.f32 1.442695, %v1071_v23  ;;  %v3990_v50 = vrot.slane %v3280_v30, 4  ;;  %v3352_v25 = vpop.eup %2585  ;;  %v1230_v48 = vmul.f32 1.442695, %v1110_v4 }
 0x18f   : > { %v1251_v29 = vadd.f32 %v3338_v5, %v1250_v36  ;;  %3991 = vst [vmem:[#allocation31_spill] sm:$0xff] %v3352_v25  ;;  %2597 = vpow2.f32 %v1206_v58  ;;  %v1027_v9 = vsub.f32 %v3140_v12, %v3277_v57  ;;  %v3357_v38 = vpop.eup %2587  ;;  %v1083_v42 = vmul.f32 0.088388346, %v1019_v51  ;;  %v3994_v51 = vld [vmem:[#allocation23_spill] sm:$0xff] }
 0x190   : > { %v964_v2 = vmax.f32 %v3280_v30, %v3990_v50  ;;  %3992 = vst [vmem:[#allocation32_spill] sm:$0xff] %v3357_v38  ;;  %2599 = vpow2.f32 %v1144_v40  ;;  %v1160_v11 = vmul.f32 1.442695, %v1075_v45  ;;  %v1238_v56 = vmul.f32 1.442695, %v1114_v41 }
 0x191   : > { %v1252_v8 = vadd.f32 %v3345_v43, %v1251_v29  ;;  %v3359_v53 = vpop.eup %2589  ;;  %2601 = vpow2.f32 %v1214_v31  ;;  %v1031_v4 = vsub.f32 %v3152_v20, %v3277_v57  ;;  %v1087_v23 = vmul.f32 0.088388346, %v1023_v62 }
 0x192   : > { %v965_v24 = vrot.slane %v964_v2, 2  ;;  %v3364_v19 = vpop.eup %2591  ;;  %2603 = vpow2.f32 %v1152_v28  ;;  %v1168_v12 = vmul.f32 1.442695, %v1079_v33  ;;  %v1035_v31 = vsub.f32 %v3994_v51, %v3277_v57 }
 0x193   : > { %v1253_v30 = vadd.f32 %v3352_v25, %v1252_v8  ;;  %v3366_v58 = vpop.eup %2593  ;;  %2605 = vpow2.f32 %v1222_v61  ;;  %v1267_v41 = vadd.f32 %v3364_v19, %v3359_v53  ;;  %v1091_v20 = vmul.f32 0.088388346, %v1027_v9 }
 0x194   : > { %v966_v44 = vmax.f32 %v964_v2, %v965_v24  ;;  %3993 = vst [vmem:[#allocation33_spill] sm:$0xff] %v3366_v58  ;;  %v3373_v45 = vpop.eup %2595  ;;  %2607 = vpow2.f32 %v1160_v11  ;;  %v1176_v40 = vmul.f32 1.442695, %v1083_v42  ;;  %v981_v33 = vmax.f32 %v3285_v17, %v3320_v46  ;;  %v3996_v2 = vld [vmem:[#allocation25_spill] sm:$0xff] }
 0x195   : > { %v1254_v36 = vadd.f32 %v3357_v38, %v1253_v30  ;;  %v3375_v62 = vpop.eup %2597  ;;  %2609 = vpow2.f32 %v1230_v48  ;;  %v1268_v28 = vadd.f32 %v3373_v45, %v1267_v41  ;;  %v1039_v8 = vsub.f32 %v3996_v2, %v3277_v57 }
 0x196   : > { %v967_v29 = vrot.slane %v966_v44, 1  ;;  %3995 = vst [vmem:[#allocation23_spill] sm:$0xff] %v3375_v62  ;;  %v3381_v50 = vpop.eup %2599  ;;  %v1095_v24 = vmul.f32 0.088388346, %v1031_v4  ;;  %2611 = vpow2.f32 %v1168_v12  ;;  %v1184_v9 = vmul.f32 1.442695, %v1087_v23  ;;  %v3395_v4 = vpop.f32.mrf.mxu3 }
 0x197   : > { %v1255_v61 = vadd.f32 %v3366_v58, %v1254_v36  ;;  %v3385_v42 = vpop.eup %2601  ;;  %2613 = vpow2.f32 %v1238_v56  ;;  %v1043_v17 = vsub.f32 %v3188_v6, %v3277_v57  ;;  %v1269_v48 = vadd.f32 %v3381_v50, %v1268_v28  ;;  %v4005_v58 = vld [vmem:[#allocation16_spill] sm:$0xff] }
 0x198   : > { %3997 = vst [vmem:[#allocation25_spill] sm:$0xff] %v3385_v42  ;;  %v3391_v30 = vpop.eup %2603  ;;  %v1099_v36 = vmul.f32 0.088388346, %v1035_v31  ;;  %2615 = vpow2.f32 %v1176_v40  ;;  %v1192_v51 = vmul.f32 1.442695, %v1091_v20  ;;  %v3393_v41 = vmax.f32 %v966_v44, %v967_v29  ;;  %v4002_v31 = vld [vmem:[#allocation27_spill] sm:$0xff] }
 0x199   : > { %v1256_v11 = vadd.f32 %v3375_v62, %v1255_v61  ;;  %3998 = vst [vmem:[#allocation34_spill] sm:$0xff] %v3391_v30  ;;  %v3397_v23 = vpop.eup %2605  ;;  %v982_v56 = vmax.f32 %v981_v33, %v3347_v47  ;;  %v4000_v61 = vld [vmem:[#allocation26_spill] sm:$0xff]  ;;  %v1270_v28 = vadd.f32 %v3391_v30, %v1269_v48  ;;  %v1051_v20 = vsub.f32 %v4002_v31, %v3277_v57 }
 0x19a   : > { %3999 = vst [vmem:[#allocation35_spill] sm:$0xff] %v3397_v23  ;;  %v1047_v6 = vsub.f32 %v4000_v61, %v3277_v57  ;;  %v3404_v2 = vpop.eup %2607  ;;  %v1103_v44 = vmul.f32 0.088388346, %v1039_v8  ;;  %2617 = vpow2.f32 %v1184_v9  ;;  %v1200_v40 = vmul.f32 1.442695, %v1095_v24  ;;  %v4006_v57 = vld [vmem:[#allocation17_spill] sm:$0xff] }
 0x19b   : > { %v1257_v12 = vadd.f32 %v3385_v42, %v1256_v11  ;;  %4001 = vst [vmem:[#allocation26_spill] sm:$0xff] %v3404_v2  ;;  %v3408_v29 = vpop.eup %2609  ;;  %v1107_v33 = vmul.f32 0.088388346, %v1043_v17  ;;  %v1271_v11 = vadd.f32 %v3404_v2, %v1270_v28  ;;  %v983_v42 = vmax.f32 %v982_v56, %v3395_v4  ;;  %v4008_v28 = vld [vmem:[#allocation18_spill] sm:$0xff] }
 0x19c   : > { %4003 = vst [vmem:[#allocation27_spill] sm:$0xff] %v3408_v29  ;;  %v3413_v61 = vpop.eup %2611  ;;  %2619 = vpow2.f32 %v1192_v51  ;;  %v1208_v48 = vmul.f32 1.442695, %v1099_v36  ;;  %v992_v38 = vsub.f32 %v4005_v58, %v3393_v41  ;;  %v996_v8 = vsub.f32 %v4006_v57, %v3393_v41  ;;  %v4010_v57 = vld [vmem:[#allocation20_spill] sm:$0xff]  ;;  %v2486_v2 = vld [vmem:[%s3124_s18 + $0xd0] sm:$0xff] }
 0x19d   : > { %v1258_v62 = vadd.f32 %v3397_v23, %v1257_v12  ;;  %4004 = vst [vmem:[#allocation36_spill] sm:$0xff] %v3413_v61  ;;  %v3419_v24 = vpop.eup %2613  ;;  %v1111_v12 = vmul.f32 0.088388346, %v1047_v6  ;;  %v1272_v17 = vadd.f32 %v3413_v61, %v1271_v11  ;;  %v1000_v56 = vsub.f32 %v4008_v28, %v3393_v41 }
 0x19e   : > { %4007 = vst [vmem:[#allocation16_spill] sm:$0xff] %v3419_v24  ;;  %v3425_v31 = vpop.eup %2615  ;;  %v1115_v51 = vmul.f32 0.088388346, %v1051_v20  ;;  %2621 = vpow2.f32 %v1200_v40  ;;  %v1216_v36 = vmul.f32 1.442695, %v1103_v44  ;;  %v1004_v25 = vsub.f32 %v4010_v57, %v3393_v41 }
 0x19f   : > { %v1259_v9 = vadd.f32 %v3408_v29, %v1258_v62  ;;  %4009 = vst [vmem:[#allocation17_spill] sm:$0xff] %v3425_v31  ;;  %v1273_v23 = vadd.f32 %v3425_v31, %v1272_v17  ;;  %v984_v43 = vrot.slane %v983_v42, 4  ;;  %2623 = vpow2.f32 %v1208_v48 }
 0x1a0   : > { %v3431_v62 = vpop.eup %2617  ;;  %v1224_v6 = vmul.f32 1.442695, %v1107_v33  ;;  %v1056_v11 = vmul.f32 0.088388346, %v992_v38  ;;  %v1060_v29 = vmul.f32 0.088388346, %v996_v8  ;;  %2625 = vpow2.f32 %v1216_v36 }
 0x1a1   : > { %v1260_v58 = vadd.f32 %v3419_v24, %v1259_v9  ;;  %4011 = vst [vmem:[#allocation18_spill] sm:$0xff] %v3431_v62  ;;  %v1232_v28 = vmul.f32 1.442695, %v1111_v12  ;;  %v1274_v61 = vadd.f32 %v3431_v62, %v1273_v23  ;;  %v1064_v20 = vmul.f32 0.088388346, %v1000_v56  ;;  %v4013_v9 = vld [vmem:[#allocation22_spill] sm:$0xff] }
 0x1a2   : > { %v3434_v40 = vpop.eup %2619  ;;  %v1240_v44 = vmul.f32 1.442695, %v1115_v51  ;;  %v1008_v17 = vsub.f32 %v4013_v9, %v3393_v41  ;;  %v1068_v31 = vmul.f32 0.088388346, %v1004_v25  ;;  %v985_v5 = vmax.f32 %v983_v42, %v984_v43  ;;  %v2473_v36 = vld [vmem:[%s3124_s18 + $0x68] sm:$0xff] }
 0x1a3   : > { %4012 = vst [vmem:[#allocation20_spill] sm:$0xff] %v3434_v40  ;;  %v1261_v24 = vrot.slane %v1260_v58, 4  ;;  %v1275_v57 = vadd.f32 %v3434_v40, %v1274_v61  ;;  %2627 = vpow2.f32 %v1224_v6  ;;  %v1012_v38 = vsub.f32 %v3108_v60, %v3393_v41  ;;  %v2465_v60 = vld [vmem:[%s3124_s18 + $0x28] sm:$0xff]  ;;  %1741 = vmatpush.bf16.msrb.mxu1 %v2473_v36 }
 0x1a4   : > { %v3439_v33 = vpop.eup %2621  ;;  %v1122_v23 = vmul.f32 1.442695, %v1056_v11  ;;  %v1130_v48 = vmul.f32 1.442695, %v1060_v29  ;;  %2629 = vpow2.f32 %v1232_v28  ;;  %v1138_v12 = vmul.f32 1.442695, %v1064_v20  ;;  %1692 = vmatpush.bf16.msrb.mxu0 %v2465_v60 }
 0x1a5   : > { %4014 = vst [vmem:[#allocation22_spill] sm:$0xff] %v3439_v33  ;;  %v1276_v8 = vadd.f32 %v3439_v33, %v1275_v57  ;;  %v3444_v56 = vpop.eup %2623  ;;  %v1016_v25 = vsub.f32 %v3116_v0, %v3393_v41  ;;  %v1020_v43 = vsub.f32 %v3130_v7, %v3393_v41  ;;  %v1072_v42 = vmul.f32 0.088388346, %v1008_v17 }
 0x1a6   : > { %4015 = vst [vmem:[#allocation37_spill] sm:$0xff] %v3444_v56  ;;  %2631 = vpow2.f32 %v1122_v23  ;;  %v1262_v61 = vadd.f32 %v1261_v24, %v1260_v58  ;;  %v1146_v29 = vmul.f32 1.442695, %v1068_v31  ;;  %v3453_v6 = vpop.eup %2625  ;;  %v1076_v11 = vmul.f32 0.088388346, %v1012_v38 }
 0x1a7   : > { %v1277_v51 = vadd.f32 %v3444_v56, %v1276_v8  ;;  %2633 = vpow2.f32 %v1130_v48  ;;  %4016 = vst [vmem:[#allocation38_spill] sm:$0xff] %v3453_v6  ;;  %v986_v28 = vrot.slane %v985_v5, 2  ;;  %v1024_v0 = vsub.f32 %v3142_v13, %v3393_v41  ;;  %v2481_v8 = vld [vmem:[%s3124_s18 + $0xa8] sm:$0xff] }
 0x1a8   : > { %2635 = vpow2.f32 %v1240_v44  ;;  %v1028_v24 = vsub.f32 %v3154_v21, %v3393_v41  ;;  %v1080_v31 = vmul.f32 0.088388346, %v1016_v25  ;;  %v1154_v58 = vmul.f32 1.442695, %v1072_v42  ;;  %1790 = vmatpush.bf16.msrb.mxu2 %v2481_v8 }
 0x1a9   : > { %v1278_v20 = vadd.f32 %v3453_v6, %v1277_v51  ;;  %2637 = vpow2.f32 %v1138_v12  ;;  %v3458_v7 = vpop.eup %2627  ;;  %v1263_v9 = vrot.slane %v1262_v61, 2  ;;  %v1084_v57 = vmul.f32 0.088388346, %v1020_v43  ;;  %v2489_v12 = vld [vmem:[%s3124_s18 + $0xe8] sm:$0xff] }
 0x1aa   : > { %4017 = vst [vmem:[#allocation39_spill] sm:$0xff] %v3458_v7  ;;  %v3462_v44 = vpop.eup %2629  ;;  %2639 = vpow2.f32 %v1146_v29  ;;  %v1162_v23 = vmul.f32 1.442695, %v1076_v11  ;;  %v987_v13 = vmax.f32 %v985_v5, %v986_v28  ;;  %v1032_v21 = vsub.f32 %v3164_v26, %v3393_v41  ;;  %1839 = vmatpush.bf16.msrb.mxu3 %v2489_v12 }
 0x1ab   : > { %4018 = vst [vmem:[#allocation40_spill] sm:$0xff] %v3462_v44  ;;  %v1279_v17 = vadd.f32 %v3458_v7, %v1278_v20  ;;  %v1088_v25 = vmul.f32 0.088388346, %v1024_v0  ;;  %2641 = vpow2.f32 %v1154_v58  ;;  %v1170_v60 = vmul.f32 1.442695, %v1080_v31 }
 0x1ac   : > { %v3465_v38 = vpop.eup %2631  ;;  %v1264_v5 = vadd.f32 %v1263_v9, %v1262_v61  ;;  %v1036_v29 = vsub.f32 %v3183_v3, %v3393_v41  ;;  %v1092_v11 = vmul.f32 0.088388346, %v1028_v24  ;;  %v1178_v26 = vmul.f32 1.442695, %v1084_v57 }
 0x1ad   : > { %v3467_v48 = vpop.eup %2633  ;;  %v1280_v51 = vadd.f32 %v3462_v44, %v1279_v17  ;;  %2643 = vpow2.f32 %v1162_v23  ;;  %v988_v0 = vrot.slane %v987_v13, 1  ;;  %v1040_v58 = vsub.f32 %v3205_v37, %v3393_v41 }
 0x1ae   : > { %v3473_v42 = vpop.eup %2635  ;;  %v1288_v43 = vadd.f32 %v3467_v48, %v3465_v38  ;;  %v1096_v17 = vmul.f32 0.088388346, %v1032_v21  ;;  %2645 = vpow2.f32 %v1170_v60  ;;  %v1186_v9 = vmul.f32 1.442695, %v1088_v25 }
 0x1af   : > { %4019 = vst [vmem:[#allocation41_spill] sm:$0xff] %v3473_v42  ;;  %v3478_v36 = vpop.eup %2637  ;;  %v1281_v28 = vadd.f32 %v3473_v42, %v1280_v51  ;;  %v1265_v3 = vrot.slane %v1264_v5, 1  ;;  %v1044_v24 = vsub.f32 %v3226_v32, %v3393_v41  ;;  %v1048_v57 = vsub.f32 %v3240_v55, %v3393_v41 }
 0x1b0   : > { %v1289_v20 = vadd.f32 %v3478_v36, %v1288_v43  ;;  %v3484_v31 = vpop.eup %2639  ;;  %v1100_v23 = vmul.f32 0.088388346, %v1036_v29  ;;  %2647 = vpow2.f32 %v1178_v26  ;;  %v1194_v43 = vmul.f32 1.442695, %v1092_v11 }
 0x1b1   : > { %v1282_v61 = vrot.slane %v1281_v28, 4  ;;  %v3493_v12 = vpop.eup %2641  ;;  %v3495_v37 = vmax.f32 %v987_v13, %v988_v0  ;;  %2649 = vpow2.f32 %v1186_v9  ;;  %v1202_v42 = vmul.f32 1.442695, %v1096_v17  ;;  %v4020_v0 = vld [vmem:[#allocation19_spill] sm:$0xff]  ;;  %v4021_v17 = vld [vmem:[#allocation21_spill] sm:$0xff] }
 0x1b2   : > { %v1290_v8 = vadd.f32 %v3484_v31, %v1289_v20  ;;  %v1104_v20 = vmul.f32 0.088388346, %v1040_v58  ;;  %v3500_v32 = vadd.f32 %v1265_v3, %v1264_v5  ;;  %v1052_v55 = vsub.f32 %v3268_v49, %v3393_v41 }
 0x1b3   : > { %v1283_v51 = vadd.f32 %v1282_v61, %v1281_v28  ;;  %v3498_v25 = vpop.eup %2643  ;;  %v1108_v29 = vmul.f32 0.088388346, %v1044_v24  ;;  %v1112_v13 = vmul.f32 0.088388346, %v1048_v57  ;;  %2651 = vpow2.f32 %v1194_v43 }
 0x1b4   : > { %v1291_v21 = vadd.f32 %v3493_v12, %v1290_v8  ;;  %v3505_v26 = vpop.eup %2645  ;;  %v1210_v11 = vmul.f32 1.442695, %v1100_v23  ;;  %v993_v61 = vsub.f32 %v4020_v0, %v3495_v37  ;;  %v997_v5 = vsub.f32 %v4021_v17, %v3495_v37 }
 0x1b5   : > { %v1284_v60 = vrot.slane %v1283_v51, 2  ;;  %v1001_v9 = vsub.f32 %v3106_v59, %v3495_v37  ;;  %2653 = vpow2.f32 %v1202_v42  ;;  %v1218_v8 = vmul.f32 1.442695, %v1104_v20 }
 0x1b6   : > { %v1292_v28 = vadd.f32 %v3498_v25, %v1291_v21  ;;  %v3514_v49 = vpop.eup %2647  ;;  %2655 = vrcp.f32 %v3500_v32  ;;  %v1226_v3 = vmul.f32 1.442695, %v1108_v29  ;;  %v1005_v57 = vsub.f32 %v3114_v63, %v3495_v37 }
 0x1b7   : > { %v1285_v41 = vadd.f32 %v1284_v60, %v1283_v51  ;;  %v3520_v23 = vpop.eup %2649  ;;  %v1116_v43 = vmul.f32 0.088388346, %v1052_v55  ;;  %2657 = vpow2.f32 %v1210_v11  ;;  %v1234_v21 = vmul.f32 1.442695, %v1112_v13 }
 0x1b8   : > { %v1293_v58 = vadd.f32 %v3505_v26, %v1292_v28  ;;  %v1057_v28 = vmul.f32 0.088388346, %v993_v61  ;;  %v1009_v42 = vsub.f32 %v3136_v10, %v3495_v37  ;;  %v1061_v51 = vmul.f32 0.088388346, %v997_v5 }
 0x1b9   : > { %v1065_v60 = vmul.f32 0.088388346, %v1001_v9  ;;  %v3525_v20 = vpop.eup %2651  ;;  %v1286_v29 = vrot.slane %v1285_v41, 1  ;;  %2659 = vpow2.f32 %v1218_v8  ;;  %v1013_v55 = vsub.f32 %v3148_v18, %v3495_v37  ;;  %v4022_v18 = vld [vmem:[#allocation24_spill] sm:$0xff] }
 0x1ba   : > { %v1294_v24 = vadd.f32 %v3514_v49, %v1293_v58  ;;  %2661 = vpow2.f32 %v1226_v3  ;;  %v1069_v11 = vmul.f32 0.088388346, %v1005_v57  ;;  %v1242_v0 = vmul.f32 1.442695, %v1116_v43 }
 0x1bb   : > { %v3530_v13 = vpop.eup %2653  ;;  %2663 = vpow2.f32 %v1234_v21  ;;  %v1017_v10 = vsub.f32 %v3156_v22, %v3495_v37  ;;  %v1124_v61 = vmul.f32 1.442695, %v1057_v28  ;;  %v1073_v5 = vmul.f32 0.088388346, %v1009_v42 }
 0x1bc   : > { %v1295_v59 = vadd.f32 %v3520_v23, %v1294_v24  ;;  %v3534_v58 = vpop.eup %2655  ;;  %v1132_v9 = vmul.f32 1.442695, %v1061_v51  ;;  %v1140_v8 = vmul.f32 1.442695, %v1065_v60  ;;  %v3539_v24 = vadd.f32 %v1286_v29, %v1285_v41 }
 0x1bd   : > { %v3537_v3 = vpop.eup %2657  ;;  %v1021_v57 = vsub.f32 %v4022_v18, %v3495_v37  ;;  %2665 = vpow2.f32 %v1124_v61  ;;  %v1077_v21 = vmul.f32 0.088388346, %v1013_v55  ;;  %v1148_v22 = vmul.f32 1.442695, %v1069_v11 }
 0x1be   : > { %v1296_v63 = vadd.f32 %v3525_v20, %v1295_v59  ;;  %2667 = vpow2.f32 %v1132_v9  ;;  %v1025_v59 = vsub.f32 %v3191_v15, %v3495_v37  ;;  %v1081_v51 = vmul.f32 0.088388346, %v1017_v10 }
 0x1bf   : > { %v3544_v28 = vpop.eup %2659  ;;  %2669 = vpow2.f32 %v1242_v0  ;;  %v1156_v60 = vmul.f32 1.442695, %v1073_v5  ;;  %v1085_v11 = vmul.f32 0.088388346, %v1021_v57  ;;  %v1164_v0 = vmul.f32 1.442695, %v1077_v21 }
 0x1c0   : > { %v1297_v17 = vadd.f32 %v3530_v13, %v1296_v63  ;;  %v3548_v42 = vpop.eup %2661  ;;  %2671 = vpow2.f32 %v1140_v8  ;;  %v1029_v63 = vsub.f32 %v3208_v39, %v3495_v37  ;;  %v1033_v61 = vsub.f32 %v3229_v16, %v3495_v37 }
 0x1c1   : > { %v3551_v29 = vpop.eup %2663  ;;  %2673 = vrcp.f32 %v3539_v24  ;;  %v1089_v5 = vmul.f32 0.088388346, %v1025_v59  ;;  %v1172_v9 = vmul.f32 1.442695, %v1081_v51  ;;  %v1037_v39 = vsub.f32 %v3246_v35, %v3495_v37 }
 0x1c2   : > { %v1298_v43 = vadd.f32 %v3537_v3, %v1297_v17  ;;  %2675 = vpow2.f32 %v1148_v22  ;;  %v1093_v16 = vmul.f32 0.088388346, %v1029_v63  ;;  %v1180_v21 = vmul.f32 1.442695, %v1085_v11 }
 0x1c3   : > { %v3557_v15 = vpop.eup %2665  ;;  %2677 = vpow2.f32 %v1156_v60  ;;  %v1041_v59 = vsub.f32 %v3272_v27, %v3495_v37  ;;  %v1097_v60 = vmul.f32 0.088388346, %v1033_v61  ;;  %v1331_v44 = vmul.f32 %v3534_v58, %v3500_v32 }
 0x1c4   : > { %v1299_v41 = vadd.f32 %v3544_v28, %v1298_v43  ;;  %v3561_v10 = vpop.eup %2667  ;;  %2679 = vpow2.f32 %v1164_v0  ;;  %v1045_v63 = vsub.f32 %v3320_v46, %v3495_v37  ;;  %v1101_v11 = vmul.f32 0.088388346, %v1037_v39 }
 0x1c5   : > { %v3564_v8 = vpop.eup %2669  ;;  %v1309_v18 = vadd.f32 %v3561_v10, %v3557_v15  ;;  %2681 = vpow2.f32 %v1172_v9  ;;  %v1196_v7 = vmul.f32 1.442695, %v1093_v16  ;;  %v1105_v61 = vmul.f32 0.088388346, %v1041_v59 }
 0x1c6   : > { %v1300_v55 = vadd.f32 %v3548_v42, %v1299_v41  ;;  %v3570_v57 = vpop.eup %2671  ;;  %2683 = vpow2.f32 %v1180_v21  ;;  %v1049_v46 = vsub.f32 %v3347_v47, %v3495_v37  ;;  %v1204_v39 = vmul.f32 1.442695, %v1097_v60 }
 0x1c7   : > { %v3573_v22 = vpop.eup %2673  ;;  %v1310_v41 = vadd.f32 %v3570_v57, %v1309_v18  ;;  %v1053_v56 = vsub.f32 %v3395_v4, %v3495_v37  ;;  %v1109_v33 = vmul.f32 0.088388346, %v1045_v63  ;;  %vm1336_vm0 = vweird.f32 %v3534_v58 }
 0x1c8   : > { %v1301_v17 = vadd.f32 %v3551_v29, %v1300_v55  ;;  %v3578_v51 = vpop.eup %2675  ;;  %v1188_v55 = vmul.f32 1.442695, %v1089_v5  ;;  %v1345_v27 = vmul.f32 %v3573_v22, %v3539_v24  ;;  %v1113_v60 = vmul.f32 0.088388346, %v1049_v46 }
 0x1c9   : > { %v1311_v0 = vadd.f32 %v3578_v51, %v1310_v41  ;;  %v1332_v41 = vsub.f32 1.0, %v1331_v44  ;;  %v1117_v4 = vmul.f32 0.088388346, %v1053_v56  ;;  %vm1350_vm1 = vweird.f32 %v3573_v22 }
 0x1ca   : > { %v1302_v43 = vadd.f32 %v3564_v8, %v1301_v17  ;;  %v3585_v17 = vpop.eup %2677  ;;  %2685 = vpow2.f32 %v1188_v55  ;;  %v1346_v16 = vsub.f32 1.0, %v1345_v27  ;;  %v1236_v56 = vmul.f32 1.442695, %v1113_v60 }
 0x1cb   : > { %v1312_v5 = vadd.f32 %v3585_v17, %v1311_v0  ;;  %v3590_v9 = vpop.eup %2679  ;;  %2687 = vpow2.f32 %v1196_v7  ;;  %v1220_v0 = vmul.f32 1.442695, %v1105_v61  ;;  %v1333_v44 = vmul.f32 %v3534_v58, %v1332_v41 }
 0x1cc   : > { %v1303_v35 = vrot.slane %v1302_v43, 4  ;;  %v3597_v21 = vpop.eup %2681  ;;  %2689 = vpow2.f32 %v1204_v39  ;;  %v1347_v63 = vmul.f32 %v3573_v22, %v1346_v16  ;;  %v1228_v7 = vmul.f32 1.442695, %v1109_v33  ;;  %v2464_v16 = vld [vmem:[%s3124_s18 + $0x20] sm:$0xff] }
 0x1cd   : > { %v3600_v62 = vpop.eup %2683  ;;  %v1244_v46 = vmul.f32 1.442695, %v1117_v4  ;;  %vm1335_vm2 = vweird.f32 %v3500_v32  ;;  %v1339_v39 = vand.u32 2147483647, %v3500_v32  ;;  %v1355_v41 = vand.u32 2147483648, %v3539_v24  ;;  %1693 = vmatpush.bf16.msrb.mxu0 %v2464_v16 }
 0x1ce   : > { %v1304_v18 = vadd.f32 %v1303_v35, %v1302_v43  ;;  %v1313_v43 = vadd.f32 %v3590_v9, %v1312_v5  ;;  %v1212_v35 = vmul.f32 1.442695, %v1101_v11  ;;  %v1348_v33 = vadd.f32 %v3573_v22, %v1347_v63  ;;  %vm3631_vm3 = vmor %vm1335_vm2, %vm1336_vm0 }
 0x1cf   : > { %vm1349_vm4 = vweird.f32 %v3539_v24  ;;  %vm1340_vm6 = vcmp.eq.f32.partialorder %v1339_v39, 8.507059e+37 }
 0x1d0   : > { %v1305_v6 = vrot.slane %v1304_v18, 2  ;;  %v1314_v40 = vadd.f32 %v3597_v21, %v1313_v43  ;;  %v3604_v55 = vpop.eup %2685  ;;  %2691 = vpow2.f32 %v1212_v35  ;;  %vm3644_vm5 = vmor %vm1349_vm4, %vm1350_vm1 }
 0x1d1   : > { %2693 = vpow2.f32 %v1220_v0  ;;  %v3610_v27 = vpop.eup %2687  ;;  %v1352_v63 = vsel %vm3644_vm5, %v3573_v22, %v1348_v33  ;;  %v2480_v33 = vld [vmem:[%s3124_s18 + $0xa0] sm:$0xff] }
 0x1d2   : > { %v1306_v59 = vadd.f32 %v1305_v6, %v1304_v18  ;;  %v1315_v37 = vadd.f32 %v3600_v62, %v1314_v40  ;;  %v1334_v40 = vadd.f32 %v3534_v58, %v1333_v44  ;;  %v1341_v18 = vand.u32 2147483648, %v3500_v32  ;;  %v3617_v5 = vpop.eup %2689  ;;  %1791 = vmatpush.bf16.msrb.mxu2 %v2480_v33  ;;  %v2487_v44 = vld [vmem:[%s3124_s18 + $0xd8] sm:$0xff] }
 0x1d4   : > { %v1307_v47 = vrot.slane %v1306_v59, 1  ;;  %v1316_v11 = vadd.f32 %v3604_v55, %v1315_v37  ;;  %v1338_v60 = vsel %vm3631_vm3, %v3534_v58, %v1334_v40  ;;  %v1342_v37 = vor.u32 1.1754944e-38, %v1341_v18  ;;  %v2471_v40 = vld [vmem:[%s3124_s18 + $0x58] sm:$0xff] }
 0x1d5   : > { %v1356_v58 = vor.u32 1.1754944e-38, %v1355_v41 }
 0x1d6   : > { %v3607_v6 = vadd.f32 %v1307_v47, %v1306_v59  ;;  %v1317_v61 = vadd.f32 %v3610_v27, %v1316_v11  ;;  %v2472_v59 = vld [vmem:[%s3124_s18 + $0x60] sm:$0xff]  ;;  %v3627_v35 = vpop.eup %2691  ;;  %v1353_v47 = vand.u32 2147483647, %v3539_v24 }
 0x1d7   : > { %v3637_v32 = vpop.eup %2693  ;;  %1742 = vmatpush.bf16.msrb.mxu1 %v2472_v59 }
 0x1d8   : > { %2695 = vrcp.f32 %v3607_v6  ;;  %v1318_v43 = vadd.f32 %v3617_v5, %v1317_v61  ;;  %vm1354_vm7 = vcmp.eq.f32.partialorder %v1353_v47, 8.507059e+37  ;;  %v1367_v41 = vand.u32 2147483647, %v3607_v6 }
 0x1d9   : > { %2697 = vpow2.f32 %v1228_v7  ;;  %v3660_v18 = vsel %vm1354_vm7, %v1356_v58, %v1352_v63  ;;  %v1369_v59 = vand.u32 2147483648, %v3607_v6  ;;  %v2462_v63 = vld [vmem:[%s3124_s18 + $0x10] sm:$0xff]  ;;  %vm1363_vm9 = vweird.f32 %v3607_v6 }
 0x1da   : > { %2699 = vpow2.f32 %v1236_v56  ;;  %v1319_v4 = vadd.f32 %v3627_v35, %v1318_v43  ;;  %v2463_v56 = vld [vmem:[%s3124_s18 + $0x18] sm:$0xff]  ;;  %v3658_v43 = vsel %vm1340_vm6, %v1342_v37, %v1338_v60  ;;  %v2470_v58 = vld [vmem:[%s3124_s18 + $0x50] sm:$0xff]  ;;  %vm1368_vm11 = vcmp.eq.f32.partialorder %v1367_v41, 8.507059e+37 }
 0x1db   : > { %2701 = vpow2.f32 %v1244_v46  ;;  %v2488_v46 = vld [vmem:[%s3124_s18 + $0xe0] sm:$0xff]  ;;  %1694 = vmatpush.bf16.msrb.mxu0 %v2463_v56  ;;  %1743 = vmatpush.bf16.msrb.mxu1 %v2471_v40  ;;  %v2479_v60 = vld [vmem:[%s3124_s18 + $0x98] sm:$0xff]  ;;  %v1387_v56 = vmul.f32 %v3359_v53, %v3660_v18  ;;  %v1391_v40 = vmul.f32 %v3364_v19, %v3660_v18  ;;  %v1370_v33 = vor.u32 1.1754944e-38, %v1369_v59  ;;  %v2469_v53 = vld [vmem:[%s3124_s18 + $0x48] sm:$0xff] }
 0x1dc   : > { %v1320_v11 = vadd.f32 %v3637_v32, %v1319_v4  ;;  %1840 = vmatpush.bf16.msrb.mxu3 %v2488_v46  ;;  %v1386_v4 = vmul.f32 %v3300_v52, %v3658_v43  ;;  %v2461_v46 = vld [vmem:[%s3124_s18 + $0x8] sm:$0xff]  ;;  %1792 = vmatpush.bf16.msrb.mxu2 %v2479_v60 }
 0x1dd   : > { %v1451_v19 = vpack.c.bf16 %v1391_v40, %v1387_v56  ;;  %v2485_v56 = vld [vmem:[%s3124_s18 + $0xc8] sm:$0xff] }
 0x1de   : > { %v2696_v24 = vpop.eup %2695 }
 0x1df   : > { %v1359_v7 = vmul.f32 %v2696_v24, %v3607_v6  ;;  %v3656_v61 = vpop.eup %2697  ;;  %vm1364_vm8 = vweird.f32 %v2696_v24  ;;  %1695 = vmatpush.bf16.msrb.mxu0 %v2462_v63  ;;  %1744 = vmatpush.bf16.msrb.mxu1 %v2470_v58 }
 0x1e0   : > { %v1321_v22 = vadd.f32 %v3656_v61, %v1320_v11  ;;  %v3665_v39 = vpop.eup %2699  ;;  %vm3687_vm10 = vmor %vm1363_vm9, %vm1364_vm8  ;;  %1841 = vmatpush.bf16.msrb.mxu3 %v2487_v44  ;;  %v2477_v44 = vld [vmem:[%s3124_s18 + $0x88] sm:$0xff] }
 0x1e1   : > { %v1360_v16 = vsub.f32 1.0, %v1359_v7  ;;  %v3674_v37 = vpop.eup %2701  ;;  %v4027_v7 = vld [vmem:[#allocation28_spill] sm:$0xff] }
 0x1e2   : > { %v1322_v47 = vadd.f32 %v3665_v39, %v1321_v22  ;;  %v1390_v11 = vmul.f32 %v4027_v7, %v3658_v43 }
 0x1e3   : > { %v1361_v0 = vmul.f32 %v2696_v24, %v1360_v16  ;;  %1696 = vmatpush.bf16.msrb.mxu0 %v2461_v46  ;;  %1745 = vmatpush.bf16.msrb.mxu1 %v2469_v53 }
 0x1e4   : > { %v1323_v52 = vadd.f32 %v3674_v37, %v1322_v47  ;;  %v1450_v7 = vpack.c.bf16 %v1390_v11, %v1386_v4  ;;  %v2478_v47 = vld [vmem:[%s3124_s18 + $0x90] sm:$0xff]  ;;  %v2460_v4 = vld [vmem:[%s3124_s18] sm:$0xff]  ;;  %1842 = vmatpush.bf16.msrb.mxu3 %v2486_v2 }
 0x1e5   : > { %v1362_v16 = vadd.f32 %v2696_v24, %v1361_v0  ;;  %v2468_v11 = vld [vmem:[%s3124_s18 + $0x40] sm:$0xff]  ;;  %1793 = vmatpush.bf16.msrb.mxu2 %v2478_v47  ;;  %v1398_v47 = vmul.f32 %v3323_v14, %v3658_v43 }
 0x1e6   : > { %v1324_v0 = vrot.slane %v1323_v52, 4 }
 0x1e7   : > { %v1366_v6 = vsel %vm3687_vm10, %v2696_v24, %v1362_v16  ;;  %1697 = vmatpush.bf16.msrb.mxu0 %v2460_v4  ;;  %1746 = vmatpush.bf16.msrb.mxu1 %v2468_v11 }
 0x1e8   : > { %v1371_v59 = vsel %vm1368_vm11, %v1370_v33, %v1366_v6  ;;  %v1325_v63 = vadd.f32 %v1324_v0, %v1323_v52  ;;  %1843 = vmatpush.bf16.msrb.mxu3 %v2485_v56  ;;  %v2484_v52 = vld [vmem:[%s3124_s18 + $0xc0] sm:$0xff] }
 0x1e9   : > { %v1388_v58 = vmul.f32 %v3465_v38, %v1371_v59  ;;  %v1392_v30 = vmul.f32 %v3467_v48, %v1371_v59  ;;  %v3702_v24 = vmul.f32 %v3478_v36, %v1371_v59  ;;  %v3705_v41 = vmul.f32 %v3484_v31, %v1371_v59  ;;  %1794 = vmatpush.bf16.msrb.mxu2 %v2477_v44  ;;  %v2476_v36 = vld [vmem:[%s3124_s18 + $0x80] sm:$0xff] }
 0x1ea   : > { %v1326_v60 = vrot.slane %v1325_v63, 2  ;;  %1698 = vmatmul.bf16.vlgmr.msrb.gmra.mxu0 %v1450_v7  ;;  %1747 = vmatmul.bf16.vlgmr.msrb.gmra.mxu1 %v1451_v19  ;;  %v3714_v31 = vmul.f32 %v3493_v12, %v1371_v59  ;;  %v3717_v2 = vmul.f32 %v3498_v25, %v1371_v59  ;;  %v3723_v33 = vmul.f32 %v3514_v49, %v1371_v59 }
 0x1eb   : > { %v1452_v38 = vpack.c.bf16 %v1392_v30, %v1388_v58  ;;  %v1456_v48 = vpack.c.bf16 %v3705_v41, %v3702_v24  ;;  %v3720_v30 = vmul.f32 %v3505_v26, %v1371_v59  ;;  %v3730_v12 = vmul.f32 %v3520_v23, %v1371_v59  ;;  %v4030_v41 = vld [vmem:[#allocation34_spill] sm:$0xff] }
 0x1ec   : > { %v1327_v40 = vadd.f32 %v1326_v60, %v1325_v63  ;;  %1844 = vmatpush.bf16.msrb.mxu3 %v2484_v52  ;;  %v1460_v46 = vpack.c.bf16 %v3717_v2, %v3714_v31  ;;  %v3733_v25 = vmul.f32 %v3525_v20, %v1371_v59  ;;  %v3736_v26 = vmul.f32 %v3530_v13, %v1371_v59  ;;  %v4036_v31 = vld [vmem:[#allocation31_spill] sm:$0xff] }
 0x1ed   : > { %1795 = vmatpush.bf16.msrb.mxu2 %v2476_v36  ;;  %v1464_v53 = vpack.c.bf16 %v3723_v33, %v3720_v30  ;;  %v3741_v7 = vmul.f32 %v3537_v3, %v1371_v59  ;;  %v3744_v19 = vmul.f32 %v3544_v28, %v1371_v59  ;;  %v3749_v20 = vmul.f32 %v3548_v42, %v1371_v59  ;;  %v4040_v30 = vld [vmem:[#allocation33_spill] sm:$0xff] }
 0x1ee   : > { %v1328_v16 = vrot.slane %v1327_v40, 1  ;;  %v1468_v49 = vpack.c.bf16 %v3733_v25, %v3730_v12  ;;  %v1394_v13 = vmul.f32 %v3318_v34, %v3658_v43  ;;  %v1395_v3 = vmul.f32 %v3373_v45, %v3660_v18  ;;  %v4044_v12 = vld [vmem:[#allocation25_spill] sm:$0xff] }
 0x1ef   : > { %v1472_v23 = vpack.c.bf16 %v3741_v7, %v3736_v26  ;;  %v1399_v28 = vmul.f32 %v3381_v50, %v3660_v18  ;;  %v1476_v63 = vpack.c.bf16 %v3749_v20, %v3744_v19  ;;  %v3762_v58 = vmul.f32 %v3551_v29, %v1371_v59  ;;  %v4048_v26 = vld [vmem:[#allocation27_spill] sm:$0xff] }
 0x1f0   : > { %v1329_v22 = vadd.f32 %v1328_v16, %v1327_v40  ;;  %1796 = vmatmul.bf16.vlgmr.msrb.gmra.mxu2 %v1452_v38  ;;  %v3765_v4 = vmul.f32 %v3564_v8, %v1371_v59  ;;  %v1454_v60 = vpack.c.bf16 %v1398_v47, %v1394_v13  ;;  %v1418_v2 = vmul.f32 %v4036_v31, %v3658_v43 }
 0x1f1   : > { %v1455_v44 = vpack.c.bf16 %v1399_v28, %v1395_v3  ;;  %v1426_v33 = vmul.f32 %v4040_v30, %v3658_v43  ;;  %v1434_v25 = vmul.f32 %v4044_v12, %v3658_v43  ;;  %v1442_v7 = vmul.f32 %v4048_v26, %v3658_v43 }
 0x1f2   : > { %2703 = vrcp.f32 %v1329_v22  ;;  %v1383_v34 = vand.u32 2147483648, %v1329_v22  ;;  %v1381_v14 = vand.u32 2147483647, %v1329_v22  ;;  %v1480_v45 = vpack.c.bf16 %v3765_v4, %v3762_v58 }
 0x1f3   : > { %vm1377_vm13 = vweird.f32 %v1329_v22 }
 0x1f4   : > { %v1384_v56 = vor.u32 1.1754944e-38, %v1383_v34  ;;  %vm1382_vm15 = vcmp.eq.f32.partialorder %v1381_v14, 8.507059e+37 }
 0x1f8   : > { %v2704_v6 = vpop.eup %2703 }
 0x1f9   : > { %v1373_v0 = vmul.f32 %v2704_v6, %v1329_v22  ;;  %vm1378_vm12 = vweird.f32 %v2704_v6 }
 0x1fa   : > { %vm1379_vm14 = vmor %vm1377_vm13, %vm1378_vm12  ;;  %1703 = vmatmul.bf16.gmra.mxu0 %v1454_v60  ;;  %1752 = vmatmul.bf16.gmra.mxu1 %v1455_v44  ;;  %v4035_v60 = vld [vmem:[#allocation17_spill] sm:$0xff] }
 0x1fb   : > { %v1374_v42 = vsub.f32 1.0, %v1373_v0  ;;  %v1415_v44 = vmul.f32 %v4035_v60, %v3660_v18 }
 0x1fd   : > { %v1375_v11 = vmul.f32 %v2704_v6, %v1374_v42  ;;  %v4033_v42 = vld [vmem:[#allocation30_spill] sm:$0xff] }
 0x1fe   : > { %v1414_v34 = vmul.f32 %v4033_v42, %v3658_v43 }
 0x1ff   : > { %v1376_v50 = vadd.f32 %v2704_v6, %v1375_v11  ;;  %v4034_v11 = vld [vmem:[#allocation36_spill] sm:$0xff] }
 0x200   : > { %1801 = vmatmul.bf16.gmra.mxu2 %v1456_v48  ;;  %v4031_v48 = vld [vmem:[#allocation26_spill] sm:$0xff]  ;;  %v1411_v14 = vmul.f32 %v4034_v11, %v3660_v18 }
 0x201   : > { %v1380_v29 = vsel %vm1379_vm14, %v2704_v6, %v1376_v50 }
 0x202   : > { %v1385_v38 = vsel %vm1382_vm15, %v1384_v56, %v1380_v29  ;;  %v1463_v56 = vpack.c.bf16 %v1415_v44, %v1411_v14 }
 0x203   : > { %v1389_v8 = vmul.f32 %v3557_v15, %v1385_v38  ;;  %v1393_v59 = vmul.f32 %v3561_v10, %v1385_v38  ;;  %v1397_v40 = vmul.f32 %v3570_v57, %v1385_v38  ;;  %v1401_v16 = vmul.f32 %v3578_v51, %v1385_v38 }
 0x204   : > { %v1405_v36 = vmul.f32 %v3585_v17, %v1385_v38  ;;  %v1409_v52 = vmul.f32 %v3590_v9, %v1385_v38  ;;  %v1413_v22 = vmul.f32 %v3597_v21, %v1385_v38  ;;  %v1417_v0 = vmul.f32 %v3600_v62, %v1385_v38 }
 0x205   : > { %v1453_v13 = vpack.c.bf16 %v1393_v59, %v1389_v8  ;;  %v1457_v15 = vpack.c.bf16 %v1401_v16, %v1397_v40  ;;  %v1421_v10 = vmul.f32 %v3604_v55, %v1385_v38  ;;  %v1425_v57 = vmul.f32 %v3610_v27, %v1385_v38  ;;  %v4039_v59 = vld [vmem:[#allocation20_spill] sm:$0xff] }
 0x206   : > { %v1461_v6 = vpack.c.bf16 %v1409_v52, %v1405_v36  ;;  %v1465_v51 = vpack.c.bf16 %v1417_v0, %v1413_v22  ;;  %v1429_v17 = vmul.f32 %v3617_v5, %v1385_v38  ;;  %v1433_v9 = vmul.f32 %v3627_v35, %v1385_v38  ;;  %v4042_v22 = vld [vmem:[#allocation22_spill] sm:$0xff] }
 0x207   : > { %1845 = vmatmul.bf16.vlgmr.msrb.gmra.mxu3 %v1453_v13  ;;  %v1469_v21 = vpack.c.bf16 %v1425_v57, %v1421_v10  ;;  %v3785_v62 = vmul.f32 %v3637_v32, %v1385_v38  ;;  %v3788_v47 = vmul.f32 %v3656_v61, %v1385_v38  ;;  %v3791_v24 = vmul.f32 %v3665_v39, %v1385_v38  ;;  %v4043_v13 = vld [vmem:[#allocation37_spill] sm:$0xff] }
 0x208   : > { %v1473_v55 = vpack.c.bf16 %v1433_v9, %v1429_v17  ;;  %v3794_v27 = vmul.f32 %v3674_v37, %v1385_v38  ;;  %v1402_v5 = vmul.f32 %v3330_v1, %v3658_v43  ;;  %v1406_v32 = vmul.f32 %v3333_v54, %v3658_v43  ;;  %v4032_v1 = vld [vmem:[#allocation29_spill] sm:$0xff]  ;;  %v4038_v38 = vld [vmem:[#allocation18_spill] sm:$0xff]  ;;  %v4047_v9 = vld [vmem:[#allocation39_spill] sm:$0xff] }
 0x209   : > { %v1477_v35 = vpack.c.bf16 %v3788_v47, %v3785_v62  ;;  %v1403_v61 = vmul.f32 %v4030_v41, %v3660_v18  ;;  %v1407_v39 = vmul.f32 %v4031_v48, %v3660_v18  ;;  %v1410_v54 = vmul.f32 %v4032_v1, %v3658_v43 }
 0x20a   : > { %v1481_v3 = vpack.c.bf16 %v3794_v27, %v3791_v24  ;;  %v1458_v37 = vpack.c.bf16 %v1406_v32, %v1402_v5  ;;  %v1419_v8 = vmul.f32 %v4038_v38, %v3660_v18  ;;  %v1423_v40 = vmul.f32 %v4039_v59, %v3660_v18  ;;  %v4050_v27 = vld [vmem:[#allocation40_spill] sm:$0xff]  ;;  %v4051_v32 = vld [vmem:[#allocation41_spill] sm:$0xff] }
 0x20b   : > { %v1459_v28 = vpack.c.bf16 %v1407_v39, %v1403_v61  ;;  %v1462_v50 = vpack.c.bf16 %v1414_v34, %v1410_v54  ;;  %v1427_v0 = vmul.f32 %v4042_v22, %v3660_v18  ;;  %v1439_v62 = vmul.f32 %v4047_v9, %v3660_v18 }
 0x20c   : > { %1708 = vmatmul.bf16.gmra.mxu0 %v1458_v37  ;;  %v1467_v36 = vpack.c.bf16 %v1423_v40, %v1419_v8  ;;  %v1443_v5 = vmul.f32 %v4050_v27, %v3660_v18  ;;  %v1447_v41 = vmul.f32 %v4051_v32, %v3660_v18 }
 0x20d   : > { %1757 = vmatmul.bf16.gmra.mxu1 %v1459_v28 }
 0x20e   : > { %v1479_v48 = vpack.c.bf16 %v1447_v41, %v1443_v5 }
 0x210   : > { %1806 = vmatmul.bf16.gmra.mxu2 %v1460_v46  ;;  %v4037_v46 = vld [vmem:[#allocation32_spill] sm:$0xff] }
 0x211   : > { %v1422_v29 = vmul.f32 %v4037_v46, %v3658_v43 }
 0x213   : > { %v1466_v16 = vpack.c.bf16 %v1422_v29, %v1418_v2 }
 0x217   : > { %1850 = vmatmul.bf16.gmra.mxu3 %v1457_v15  ;;  %v1431_v15 = vmul.f32 %v4043_v13, %v3660_v18 }
 0x219   : > { %v1471_v57 = vpack.c.bf16 %v1431_v15, %v1427_v0 }
 0x21c   : > { %1713 = vmatmul.bf16.gmra.mxu0 %v1462_v50 }
 0x21d   : > { %1762 = vmatmul.bf16.gmra.mxu1 %v1463_v56 }
 0x220   : > { %1811 = vmatmul.bf16.gmra.mxu2 %v1464_v53  ;;  %v4041_v53 = vld [vmem:[#allocation23_spill] sm:$0xff] }
 0x221   : > { %v1430_v52 = vmul.f32 %v4041_v53, %v3658_v43 }
 0x223   : > { %v1470_v10 = vpack.c.bf16 %v1430_v52, %v1426_v33 }
 0x227   : > { %1855 = vmatmul.bf16.gmra.mxu3 %v1461_v6 }
 0x22c   : > { %1718 = vmatmul.bf16.gmra.mxu0 %v1466_v16 }
 0x22d   : > { %1767 = vmatmul.bf16.gmra.mxu1 %v1467_v36 }
 0x230   : > { %1816 = vmatmul.bf16.gmra.mxu2 %v1468_v49  ;;  %v4045_v49 = vld [vmem:[#allocation35_spill] sm:$0xff] }
 0x231   : > { %v1438_v6 = vmul.f32 %v4045_v49, %v3658_v43 }
 0x233   : > { %v1474_v47 = vpack.c.bf16 %v1438_v6, %v1434_v25 }
 0x237   : > { %1860 = vmatmul.bf16.gmra.mxu3 %v1465_v51  ;;  %v4046_v51 = vld [vmem:[#allocation38_spill] sm:$0xff] }
 0x238   : > { %v1435_v17 = vmul.f32 %v4046_v51, %v3660_v18 }
 0x23a   : > { %v1475_v24 = vpack.c.bf16 %v1439_v62, %v1435_v17 }
 0x23c   : > { %1723 = vmatmul.bf16.gmra.mxu0 %v1470_v10 }
 0x23d   : > { %1772 = vmatmul.bf16.gmra.mxu1 %v1471_v57 }
 0x240   : > { %1821 = vmatmul.bf16.gmra.mxu2 %v1472_v23  ;;  %v4049_v23 = vld [vmem:[#allocation16_spill] sm:$0xff] }
 0x247   : > { %1865 = vmatmul.bf16.gmra.mxu3 %v1469_v21  ;;  %v1446_v21 = vmul.f32 %v4049_v23, %v3658_v43 }
 0x249   : > { %v1478_v61 = vpack.c.bf16 %v1446_v21, %v1442_v7 }
 0x24c   : > { %1728 = vmatmul.bf16.gmra.mxu0 %v1474_v47 }
 0x24d   : > { %1777 = vmatmul.bf16.gmra.mxu1 %v1475_v24 }
 0x250   : > { %1826 = vmatmul.bf16.gmra.mxu2 %v1476_v63 }
 0x257   : > { %1870 = vmatmul.bf16.gmra.mxu3 %v1473_v55 }
 0x25c   : > { %1733 = vmatmul.bf16.gmra.mxu0 %v1478_v61 }
 0x25d   : > { %1782 = vmatmul.bf16.gmra.mxu1 %v1479_v48 }
 0x260   : > { %1831 = vmatmul.bf16.gmra.mxu2 %v1480_v45 }
 0x267   : > { %1875 = vmatmul.bf16.gmra.mxu3 %v1477_v35  ;;  %v1699_v19 = vpop.f32.mrf.mxu0  ;;  %v1748_v20 = vpop.f32.mrf.mxu1 }
 0x268   : > { %v1749_v18 = vadd.f32 %v1748_v20, %v1699_v19 }
 0x26f   : > { %v1701_v63 = vpop.f32.mrf.mxu0  ;;  %v1750_v43 = vpop.f32.mrf.mxu1 }
 0x270   : > { %v1751_v4 = vadd.f32 %v1750_v43, %v1701_v63 }
 0x273   : > { %v1797_v55 = vpop.f32.mrf.mxu2 }
 0x274   : > { %v1798_v42 = vadd.f32 %v1797_v55, %v1749_v18 }
 0x277   : > { %1880 = vmatmul.bf16.gmra.mxu3 %v1481_v3  ;;  %v1704_v39 = vpop.f32.mrf.mxu0  ;;  %v1753_v37 = vpop.f32.mrf.mxu1 }
 0x278   : > { %v1754_v50 = vadd.f32 %v1753_v37, %v1704_v39 }
 0x27b   : > { %v1799_v28 = vpop.f32.mrf.mxu2 }
 0x27c   : > { %v1800_v3 = vadd.f32 %v1799_v28, %v1751_v4 }
 0x27f   : > { %v1706_v1 = vpop.f32.mrf.mxu0  ;;  %v1755_v54 = vpop.f32.mrf.mxu1 }
 0x280   : > { %v1756_v8 = vadd.f32 %v1755_v54, %v1706_v1 }
 0x283   : > { %v1802_v34 = vpop.f32.mrf.mxu2 }
 0x284   : > { %v1803_v2 = vadd.f32 %v1802_v34, %v1754_v50 }
 0x289   : > { %v1709_v45 = vpop.f32.mrf.mxu0 }
 0x28a   : > { %v1846_v11 = vpop.f32.mrf.mxu3  ;;  %v1758_v35 = vpop.f32.mrf.mxu1 }
 0x28b   : > { %v1847_v58 = vadd.f32 %v1846_v11, %v1798_v42  ;;  %v1804_v14 = vpop.f32.mrf.mxu2  ;;  %v1759_v53 = vadd.f32 %v1758_v35, %v1709_v45 }
 0x28c   : > { %v1805_v59 = vadd.f32 %v1804_v14, %v1756_v8 }
 0x28d   : > { %1937 = vst [vmem:[%s3867_s29] sm:$0xff] %v1847_v58 }
 0x291   : > { %v1711_v56 = vpop.f32.mrf.mxu0 }
 0x292   : > { %v1848_v60 = vpop.f32.mrf.mxu3  ;;  %v1760_v31 = vpop.f32.mrf.mxu1 }
 0x293   : > { %v1849_v44 = vadd.f32 %v1848_v60, %v1800_v3  ;;  %v1807_v46 = vpop.f32.mrf.mxu2  ;;  %v1761_v57 = vadd.f32 %v1760_v31, %v1711_v56 }
 0x294   : > { %v1808_v52 = vadd.f32 %v1807_v46, %v1759_v53 }
 0x295   : > { %1938 = vst [vmem:[%s3867_s29 + $0x8] sm:$0xff] %v1849_v44 }
 0x299   : > { %v1714_v40 = vpop.f32.mrf.mxu0 }
 0x29a   : > { %v1851_v29 = vpop.f32.mrf.mxu3  ;;  %v1763_v16 = vpop.f32.mrf.mxu1 }
 0x29b   : > { %v1852_v38 = vadd.f32 %v1851_v29, %v1803_v2  ;;  %v1809_v36 = vpop.f32.mrf.mxu2  ;;  %v1764_v9 = vadd.f32 %v1763_v16, %v1714_v40 }
 0x29c   : > { %v1810_v12 = vadd.f32 %v1809_v36, %v1761_v57 }
 0x29d   : > { %1939 = vst [vmem:[%s3867_s29 + $0x10] sm:$0xff] %v1852_v38 }
 0x2a1   : > { %v1716_v0 = vpop.f32.mrf.mxu0 }
 0x2a2   : > { %v1853_v30 = vpop.f32.mrf.mxu3  ;;  %v1765_v15 = vpop.f32.mrf.mxu1 }
 0x2a3   : > { %v1854_v33 = vadd.f32 %v1853_v30, %v1805_v59  ;;  %v1812_v22 = vpop.f32.mrf.mxu2  ;;  %v1766_v7 = vadd.f32 %v1765_v15, %v1716_v0 }
 0x2a4   : > { %v1813_v62 = vadd.f32 %v1812_v22, %v1764_v9 }
 0x2a5   : > { %1940 = vst [vmem:[%s3867_s29 + $0x18] sm:$0xff] %v1854_v33 }
 0x2a9   : > { %v1719_v51 = vpop.f32.mrf.mxu0 }
 0x2aa   : > { %v1856_v13 = vpop.f32.mrf.mxu3  ;;  %v1768_v17 = vpop.f32.mrf.mxu1 }
 0x2ab   : > { %v1857_v10 = vadd.f32 %v1856_v13, %v1808_v52  ;;  %v1814_v25 = vpop.f32.mrf.mxu2  ;;  %v1769_v61 = vadd.f32 %v1768_v17, %v1719_v51 }
 0x2ac   : > { %v1815_v27 = vadd.f32 %v1814_v25, %v1766_v7 }
 0x2ad   : > { %1941 = vst [vmem:[%s3867_s29 + $0x20] sm:$0xff] %v1857_v10 }
 0x2b1   : > { %v1721_v23 = vpop.f32.mrf.mxu0 }
 0x2b2   : > { %v1858_v49 = vpop.f32.mrf.mxu3  ;;  %v1770_v21 = vpop.f32.mrf.mxu1 }
 0x2b3   : > { %v1859_v6 = vadd.f32 %v1858_v49, %v1810_v12  ;;  %v1817_v47 = vpop.f32.mrf.mxu2  ;;  %v1771_v39 = vadd.f32 %v1770_v21, %v1721_v23 }
 0x2b4   : > { %v1818_v48 = vadd.f32 %v1817_v47, %v1769_v61 }
 0x2b5   : > { %1942 = vst [vmem:[%s3867_s29 + $0x28] sm:$0xff] %v1859_v6 }
 0x2b9   : > { %v1724_v19 = vpop.f32.mrf.mxu0 }
 0x2ba   : > { %v1861_v24 = vpop.f32.mrf.mxu3  ;;  %v1773_v20 = vpop.f32.mrf.mxu1 }
 0x2bb   : > { %v1862_v26 = vadd.f32 %v1861_v24, %v1813_v62  ;;  %v1819_v5 = vpop.f32.mrf.mxu2  ;;  %v1774_v34 = vadd.f32 %v1773_v20, %v1724_v19 }
 0x2bc   : > { %v1820_v37 = vadd.f32 %v1819_v5, %v1771_v39 }
 0x2bd   : > { %1943 = vst [vmem:[%s3867_s29 + $0x30] sm:$0xff] %v1862_v26 }
 0x2c1   : > { %v1726_v28 = vpop.f32.mrf.mxu0 }
 0x2c2   : > { %v1863_v32 = vpop.f32.mrf.mxu3  ;;  %v1775_v1 = vpop.f32.mrf.mxu1 }
 0x2c3   : > { %v1864_v41 = vadd.f32 %v1863_v32, %v1815_v27  ;;  %v1822_v43 = vpop.f32.mrf.mxu2  ;;  %v1776_v3 = vadd.f32 %v1775_v1, %v1726_v28 }
 0x2c4   : > { %v1823_v11 = vadd.f32 %v1822_v43, %v1774_v34 }
 0x2c5   : > { %1944 = vst [vmem:[%s3867_s29 + $0x38] sm:$0xff] %v1864_v41 }
 0x2c9   : > { %v1729_v45 = vpop.f32.mrf.mxu0 }
 0x2ca   : > { %v1866_v63 = vpop.f32.mrf.mxu3  ;;  %v1778_v35 = vpop.f32.mrf.mxu1 }
 0x2cb   : > { %v1867_v55 = vadd.f32 %v1866_v63, %v1818_v48  ;;  %v1824_v42 = vpop.f32.mrf.mxu2  ;;  %v1779_v56 = vadd.f32 %v1778_v35, %v1729_v45 }
 0x2cc   : > { %v1825_v60 = vadd.f32 %v1824_v42, %v1776_v3 }
 0x2cd   : > { %1945 = vst [vmem:[%s3867_s29 + $0x40] sm:$0xff] %v1867_v55 }
 0x2d1   : > { %v1731_v31 = vpop.f32.mrf.mxu0 }
 0x2d2   : > { %v1868_v18 = vpop.f32.mrf.mxu3  ;;  %v1780_v2 = vpop.f32.mrf.mxu1 }
 0x2d3   : > { %v1869_v54 = vadd.f32 %v1868_v18, %v1820_v37  ;;  %v1827_v14 = vpop.f32.mrf.mxu2  ;;  %v1781_v59 = vadd.f32 %v1780_v2, %v1731_v31 }
 0x2d4   : > { %v1828_v46 = vadd.f32 %v1827_v14, %v1779_v56 }
 0x2d5   : > { %1946 = vst [vmem:[%s3867_s29 + $0x48] sm:$0xff] %v1869_v54 }
 0x2d9   : > { %v1734_v40 = vpop.f32.mrf.mxu0 }
 0x2da   : > { %v1871_v58 = vpop.f32.mrf.mxu3  ;;  %v1783_v36 = vpop.f32.mrf.mxu1 }
 0x2db   : > { %v1872_v4 = vadd.f32 %v1871_v58, %v1823_v11  ;;  %v1829_v29 = vpop.f32.mrf.mxu2  ;;  %v1784_v52 = vadd.f32 %v1783_v36, %v1734_v40 }
 0x2dc   : > { %v1830_v16 = vadd.f32 %v1829_v29, %v1781_v59 }
 0x2dd   : > { %1947 = vst [vmem:[%s3867_s29 + $0x50] sm:$0xff] %v1872_v4 }
 0x2e1   : > { %v1736_v0 = vpop.f32.mrf.mxu0 }
 0x2e2   : > { %v1873_v44 = vpop.f32.mrf.mxu3  ;;  %v1785_v13 = vpop.f32.mrf.mxu1 }
 0x2e3   : > { %v1874_v50 = vadd.f32 %v1873_v44, %v1825_v60  ;;  %v1832_v33 = vpop.f32.mrf.mxu2  ;;  %v1786_v12 = vadd.f32 %v1785_v13, %v1736_v0 }
 0x2e4   : > { %v1833_v22 = vadd.f32 %v1832_v33, %v1784_v52 }
 0x2e5   : > { %1948 = vst [vmem:[%s3867_s29 + $0x58] sm:$0xff] %v1874_v50 }
 0x2ea   : > { %v1876_v38 = vpop.f32.mrf.mxu3 }
 0x2eb   : > { %v1877_v8 = vadd.f32 %v1876_v38, %v1828_v46  ;;  %v1834_v57 = vpop.f32.mrf.mxu2 }
 0x2ec   : > { %v1835_v25 = vadd.f32 %v1834_v57, %v1786_v12 }
 0x2ed   : > { %1949 = vst [vmem:[%s3867_s29 + $0x60] sm:$0xff] %v1877_v8 }
 0x2f2   : > { %v1878_v30 = vpop.f32.mrf.mxu3 }
 0x2f3   : > { %v1879_v53 = vadd.f32 %v1878_v30, %v1830_v16 }
 0x2f5   : > { %1950 = vst [vmem:[%s3867_s29 + $0x68] sm:$0xff] %v1879_v53 }
 0x2fa   : > { %v1881_v15 = vpop.f32.mrf.mxu3 }
 0x2fb   : > { %v1882_v10 = vadd.f32 %v1881_v15, %v1833_v22 }
 0x2fd   : > { %1951 = vst [vmem:[%s3867_s29 + $0x70] sm:$0xff] %v1882_v10 }
 0x302   : > { %v1883_v49 = vpop.f32.mrf.mxu3 }
 0x303   : > { %v1884_v6 = vadd.f32 %v1883_v49, %v1835_v25 }
 0x305   : > { %1952 = vst [vmem:[%s3867_s29 + $0x78] sm:$0xff] %v1884_v6 }
 0x306   : > { %2822 = shalt.err (!%p2819_p13)
}
 0x307   : > { %s2885_s14 = smov 128   ;;  %s2886_s1 = smov 8  }
 0x308   : > { %2499 = dma.vmem_to_hbm [thread:$0]  (%p2962_p9), %s1968_s19, 2048, %s1970_s5, %s1954_s15, %s2885_s14, %s2885_s14, %s2886_s1  }
 0x309 PF: > { %s1984_s20 = sand.u32 1, %s2861_s12   ;;  %p2512_p0 = pnand %p2109_p12, %p2969_p11 }
 0x30a   : > { %s1985_s26 = scalar_lea.sflag [#allocation5], %s1984_s20 }
 0x30b   : > { %p2513_p1 = pneg %p2512_p0 }
 0x30d   : > { %2856 = dma.done.wait (%p2513_p1), %s1985_s26, 2048  }
 0x30e   : > { %2858 = vsyncadd (%p2513_p1), %s1985_s26, 4294965248  ;;  %s22_s17 = sadd.s32 1, %s2881_s17   ;;  %s4052_s28 = sld [smem:[#allocation13_spill]] }
 0x30f   : > { %p19_p2 = scmp.ge.s32.totalorder %s22_s17, 4   ;;  %s4053_s14 = sld [smem:[#allocation15_spill]] }
 0x310   : > { %s4054_s25 = sld [smem:[#allocation14_spill]]  ;;  %s4055_s12 = smov %s2865_s13 }
 0x311   : > { %s4057_s15 = smov %s2877_s16 }
 0x312   :  { %21 = sbr.rel (!%p19_p2) target bundleno = 10 (0xa), region = 109 }
 0x314   : > { %s4056_s13 = smov %s4052_s28 }
 0x316   : > { %s4058_s16 = smov %s4054_s25 }
 0x317   :  { %1991 = vsyncpa [#allocation4], 1 }
 0x318   :  { %1993 = vsyncpa [#allocation4 + $0x1], 1 }
 0x319   :  { %1994 = vsyncpa [#allocation7], 1 }
 0x31a   :  { %1996 = vsyncpa [#allocation7 + $0x1], 1 }
 0x31b   :  { %1997 = vsyncpa [#allocation5], 1 }
 0x31c   :  { %1999 = vsyncpa [#allocation5 + $0x1], 1 }

</bundles_post_ra>
